<compile_context>
chip_gen: v6e
topology: v6e:2x2x1
jax: 0.10.0
libtpu: 0.0.40
codegen_flags: <defaults>
</compile_context>

<pallas_src>
import math
from functools import partial

import jax
import jax.numpy as jnp
from jax.experimental import pallas as pl
from jax.experimental.pallas import tpu as pltpu


def _encoder_layer_att_kernel(x_full_ref, x_q_ref,
                              wq_ref, wk_ref, wv_ref, wo_ref,
                              bq_ref, bk_ref, bv_ref, bo_ref,
                              gamma_ref, beta_ref,
                              o_ref,
                              k_sc, v_sc, qh_sc, attn_sc,
                              *, num_heads, eps, approx_recip):
    H = num_heads
    S = x_full_ref.shape[1]
    D = x_full_ref.shape[2]
    dk = D // H
    cdtype = k_sc.dtype
    scale = 1.0 / math.sqrt(dk)

    # ---- K / V projections: once per batch element, stored head-major (H, S, dk). ----
    @pl.when(pl.program_id(1) == 0)
    def _():
        xs = x_full_ref[0].astype(cdtype)                                   # (S, D)
        k = jnp.dot(xs, wk_ref[...], preferred_element_type=jnp.float32) + bk_ref[...]
        v = jnp.dot(xs, wv_ref[...], preferred_element_type=jnp.float32) + bv_ref[...]
        for h in range(H):                                                  # head-major split
            k_sc[h] = k[:, h * dk:(h + 1) * dk].astype(cdtype)
            v_sc[h] = v[:, h * dk:(h + 1) * dk].astype(cdtype)

    # ---- Q projection for this query tile. ----
    xq = x_q_ref[0]                                                         # (tq, D)
    q = jnp.dot(xq.astype(cdtype), wq_ref[...],
                preferred_element_type=jnp.float32) + bq_ref[...]           # (tq, D) f32
    for h in range(H):
        qh_sc[h] = q[:, h * dk:(h + 1) * dk].astype(cdtype)                 # (H, tq, dk)

    # ---- Attention, batched over heads (no K transpose, no concatenate). ----
    s = jnp.einsum('hqd,hkd->hqk', qh_sc[...], k_sc[...],
                   preferred_element_type=jnp.float32) * scale              # (H, tq, S)
    m = jnp.max(s, axis=-1, keepdims=True)
    p = jnp.exp(s - m)
    l = jnp.sum(p, axis=-1, keepdims=True)
    p = p * pl.reciprocal(l, approx=approx_recip)                           # EUP, not a VPU divide
    ctx = jnp.einsum('hqk,hkd->hqd', p.astype(cdtype), v_sc[...],
                     preferred_element_type=jnp.float32)                    # (H, tq, dk)

    # Merge heads -> (tq, D) via lane-aligned slice-stores into VMEM scratch.
    qh_sc[...] = ctx.astype(cdtype)          # reuse the Q-head scratch as context staging
    for h in range(H):
        attn_sc[:, h * dk:(h + 1) * dk] = qh_sc[h]

    # ---- Output projection + (eval-mode) dropout + residual + LayerNorm. ----
    mha = jnp.dot(attn_sc[...], wo_ref[...],
                  preferred_element_type=jnp.float32) + bo_ref[...]         # (tq, D) f32
    # TODO(synk): dropout is identity in eval mode; training-mode prng-mask dropout not emitted.
    y = xq.astype(jnp.float32) + mha
    mean = jnp.mean(y, axis=-1, keepdims=True)
    yc = y - mean
    var = jnp.mean(yc * yc, axis=-1, keepdims=True)
    out = yc * jax.lax.rsqrt(var + eps) * gamma_ref[...] + beta_ref[...]
    o_ref[0] = out.astype(o_ref.dtype)


def encoder_layer_att(x, params, num_heads, *, eps=1e-5, q_block=None,
                      compute_dtype=None, approx_recip=True):
    """x: (B, S, D).  params: see init_params.  compute_dtype: matmul operand dtype."""
    B, S, D = x.shape
    assert D % num_heads == 0, "d_model must be divisible by number of heads"
    dk = D // num_heads
    if compute_dtype is None:
        compute_dtype = x.dtype
    compute_dtype = jnp.dtype(compute_dtype)
    if q_block is None:
        q_block = 128 if (S % 128 == 0) else S
    assert S % q_block == 0 and (q_block == S or q_block % 8 == 0)
    n_q = S // q_block

    f32 = jnp.float32
    wq = params["wq"].astype(compute_dtype)
    wk = params["wk"].astype(compute_dtype)
    wv = params["wv"].astype(compute_dtype)
    wo = params["wo"].astype(compute_dtype)
    bq = params["bq"].astype(f32)
    bk = params["bk"].astype(f32)
    bv = params["bv"].astype(f32)
    bo = params["bo"].astype(f32)
    gamma = params["gamma"].astype(f32)
    beta = params["beta"].astype(f32)

    mat_spec = pl.BlockSpec((D, D), lambda b, q: (0, 0))              # weights stay resident
    vec_spec = pl.BlockSpec((1, D), lambda b, q: (0, 0))              # bias / gamma / beta
    x_full_spec = pl.BlockSpec((1, S, D), lambda b, q: (b, 0, 0))     # full seq (for K/V)
    x_q_spec = pl.BlockSpec((1, q_block, D), lambda b, q: (b, q, 0))  # query tile
    out_spec = pl.BlockSpec((1, q_block, D), lambda b, q: (b, q, 0))  # lane-dense output tile

    kernel = partial(_encoder_layer_att_kernel, num_heads=num_heads, eps=eps,
                     approx_recip=approx_recip)

    # Advisory cost for the XLA scheduler around the custom call.
    cost = pl.CostEstimate(
        flops=B * (8 * S * D * D + 4 * S * S * D),
        transcendentals=B * num_heads * S * S,
        bytes_accessed=(3 * B * S * D * x.dtype.itemsize
                        + 4 * D * D * compute_dtype.itemsize
                        + 6 * D * 4))

    # Explicit VMEM budget (kept within v7x's 64 MiB physical VMEM).
    c_bytes = compute_dtype.itemsize
    x_bytes = x.dtype.itemsize
    vmem_est = (2 * 4 * D * D * c_bytes                  # double-buffered weights
                + 2 * 6 * D * 4                          # biases / gamma / beta
                + 2 * S * D * x_bytes                    # full-seq activation block
                + 4 * q_block * D * x_bytes              # query tile + output tile
                + (2 * S * D + 2 * q_block * D) * c_bytes)   # scratches
    vmem_limit = int(min(max(2 * vmem_est, 32 * 1024 * 1024), 64 * 1024 * 1024))

    return pl.pallas_call(
        kernel,
        out_shape=jax.ShapeDtypeStruct((B, S, D), x.dtype),
        grid_spec=pltpu.PrefetchScalarGridSpec(
            num_scalar_prefetch=0,
            grid=(B, n_q),
            in_specs=[x_full_spec, x_q_spec,
                      mat_spec, mat_spec, mat_spec, mat_spec,
                      vec_spec, vec_spec, vec_spec, vec_spec,
                      vec_spec, vec_spec],
            out_specs=out_spec,
            scratch_shapes=[
                pltpu.VMEM((num_heads, S, dk), compute_dtype),        # K, head-major
                pltpu.VMEM((num_heads, S, dk), compute_dtype),        # V, head-major
                pltpu.VMEM((num_heads, q_block, dk), compute_dtype),  # Q heads / ctx staging
                pltpu.VMEM((q_block, D), compute_dtype),              # merged heads
            ]),
        compiler_params=pltpu.CompilerParams(
            dimension_semantics=("parallel", "arbitrary"),
            vmem_limit_bytes=vmem_limit),
        cost_estimate=cost,
    )(x, x, wq, wk, wv, wo, bq, bk, bv, bo, gamma, beta)


def init_params(key, d_model):
    """Deterministic synthetic parameters (shapes match the torch module's __init__)."""
    ks = jax.random.split(key, 8)
    s = 0.05
    return {
        "wq": s * jax.random.normal(ks[0], (d_model, d_model), jnp.float32),
        "wk": s * jax.random.normal(ks[1], (d_model, d_model), jnp.float32),
        "wv": s * jax.random.normal(ks[2], (d_model, d_model), jnp.float32),
        "wo": s * jax.random.normal(ks[3], (d_model, d_model), jnp.float32),
        "bq": s * jax.random.normal(ks[4], (1, d_model), jnp.float32),
        "bk": s * jax.random.normal(ks[5], (1, d_model), jnp.float32),
        "bv": s * jax.random.normal(ks[6], (1, d_model), jnp.float32),
        "bo": s * jax.random.normal(ks[7], (1, d_model), jnp.float32),
        "gamma": jnp.ones((1, d_model), jnp.float32),
        "beta": jnp.zeros((1, d_model), jnp.float32),
    }


def _reference(x, params, num_heads, eps=1e-5):
    """Pure-JAX reference for correctness checking."""
    B, S, D = x.shape
    dk = D // num_heads
    q = x @ params["wq"] + params["bq"]
    k = x @ params["wk"] + params["bk"]
    v = x @ params["wv"] + params["bv"]

    def split(t):  # (B, S, D) -> (B, H, S, dk)
        return t.reshape(B, S, num_heads, dk).transpose(0, 2, 1, 3)

    qh, kh, vh = split(q), split(k), split(v)
    s = jnp.einsum("bhqd,bhkd->bhqk", qh, kh) / math.sqrt(dk)
    p = jax.nn.softmax(s, axis=-1)
    a = jnp.einsum("bhqk,bhkd->bhqd", p, vh).transpose(0, 2, 1, 3).reshape(B, S, D)
    mha = a @ params["wo"] + params["bo"]
    y = x + mha
    mean = jnp.mean(y, axis=-1, keepdims=True)
    var = jnp.mean((y - mean) ** 2, axis=-1, keepdims=True)
    return (y - mean) * jax.lax.rsqrt(var + eps) * params["gamma"] + params["beta"]


if __name__ == "__main__":
    # batch, seq, d_model (lane-dense: 2 * 128), heads  ->  dk = 128, two query tiles.
    B, S, D, H = 2, 32, 256, 2

    key = jax.random.PRNGKey(0)
    kx, kp = jax.random.split(key)
    x = jax.random.normal(kx, (B, S, D), jnp.float32)
    params = init_params(kp, D)

    ref = _reference(x, params, num_heads=H)

    # 1) f32 path (exact reciprocal): strict correctness check.
    out = encoder_layer_att(x, params, num_heads=H, q_block=16,
                            compute_dtype=jnp.float32, approx_recip=False)
    out = jax.block_until_ready(out)
    assert out.shape == (B, S, D)
    assert jnp.allclose(out, ref, atol=1e-4, rtol=1e-4), "f32 kernel mismatch vs reference"

    # 2) bf16 MXU operands + f32 accumulation + approx reciprocal (perf configuration).
    out_bf = encoder_layer_att(x.astype(jnp.bfloat16), params, num_heads=H, q_block=16,
                               compute_dtype=jnp.bfloat16, approx_recip=True)
    out_bf = jax.block_until_ready(out_bf)
    assert out_bf.shape == (B, S, D)
    assert jnp.allclose(out_bf.astype(jnp.float32), ref, atol=5e-2, rtol=5e-2), \
        "bf16 kernel mismatch vs reference"

    print("KERNEL_OK")
</pallas_src>

<mosaic_0001>
module attributes {stable_mosaic.version = 11 : i64} {
  func.func @_encoder_layer_att_kernel(%arg0: i32, %arg1: i32, %arg2: memref<1x32x256xf32, #tpu.memory_space<vmem>>, %arg3: memref<1x16x256xf32, #tpu.memory_space<vmem>>, %arg4: memref<256x256xf32, #tpu.memory_space<vmem>>, %arg5: memref<256x256xf32, #tpu.memory_space<vmem>>, %arg6: memref<256x256xf32, #tpu.memory_space<vmem>>, %arg7: memref<256x256xf32, #tpu.memory_space<vmem>>, %arg8: memref<1x256xf32, #tpu.memory_space<vmem>>, %arg9: memref<1x256xf32, #tpu.memory_space<vmem>>, %arg10: memref<1x256xf32, #tpu.memory_space<vmem>>, %arg11: memref<1x256xf32, #tpu.memory_space<vmem>>, %arg12: memref<1x256xf32, #tpu.memory_space<vmem>>, %arg13: memref<1x256xf32, #tpu.memory_space<vmem>>, %arg14: memref<1x16x256xf32, #tpu.memory_space<vmem>>, %arg15: memref<2x32x128xf32, #tpu.memory_space<vmem>>, %arg16: memref<2x32x128xf32, #tpu.memory_space<vmem>>, %arg17: memref<2x16x128xf32, #tpu.memory_space<vmem>>, %arg18: memref<16x256xf32, #tpu.memory_space<vmem>>) attributes {dimension_semantics = [#tpu.dimension_semantics<parallel>, #tpu.dimension_semantics<arbitrary>], iteration_bounds = array<i64: 2, 2>, scalar_prefetch = 0 : i64, scratch_operands = 4 : i64, tpu.core_type = #tpu.core_type<tc>, window_params = [{transform_indices = @transform_0, window_bounds = array<i64: 1, 32, 256>}, {transform_indices = @transform_1, window_bounds = array<i64: 1, 16, 256>}, {pipeline_mode = #tpu.pipeline_mode<synchronous>, transform_indices = @transform_2, window_bounds = array<i64: 256, 256>}, {pipeline_mode = #tpu.pipeline_mode<synchronous>, transform_indices = @transform_3, window_bounds = array<i64: 256, 256>}, {pipeline_mode = #tpu.pipeline_mode<synchronous>, transform_indices = @transform_4, window_bounds = array<i64: 256, 256>}, {pipeline_mode = #tpu.pipeline_mode<synchronous>, transform_indices = @transform_5, window_bounds = array<i64: 256, 256>}, {pipeline_mode = #tpu.pipeline_mode<synchronous>, transform_indices = @transform_6, window_bounds = array<i64: 1, 256>}, {pipeline_mode = #tpu.pipeline_mode<synchronous>, transform_indices = @transform_7, window_bounds = array<i64: 1, 256>}, {pipeline_mode = #tpu.pipeline_mode<synchronous>, transform_indices = @transform_8, window_bounds = array<i64: 1, 256>}, {pipeline_mode = #tpu.pipeline_mode<synchronous>, transform_indices = @transform_9, window_bounds = array<i64: 1, 256>}, {pipeline_mode = #tpu.pipeline_mode<synchronous>, transform_indices = @transform_10, window_bounds = array<i64: 1, 256>}, {pipeline_mode = #tpu.pipeline_mode<synchronous>, transform_indices = @transform_11, window_bounds = array<i64: 1, 256>}, {transform_indices = @transform_12, window_bounds = array<i64: 1, 16, 256>}]} {
    %c0_i32 = arith.constant 0 : i32
    %0 = arith.cmpi eq, %arg1, %c0_i32 : i32
    %1 = arith.extui %0 : i1 to i32
    %c0_i32_0 = arith.constant 0 : i32
    %2 = arith.cmpi ne, %1, %c0_i32_0 : i32
    scf.if %2 {
      %c0_57 = arith.constant 0 : index
      %c0_58 = arith.constant 0 : index
      %c0_59 = arith.constant 0 : index
      %74 = vector.load %arg2[%c0_57, %c0_58, %c0_59] : memref<1x32x256xf32, #tpu.memory_space<vmem>>, vector<1x32x256xf32>
      %75 = vector.shape_cast %74 : vector<1x32x256xf32> to vector<32x256xf32>
      %c0_60 = arith.constant 0 : index
      %c0_61 = arith.constant 0 : index
      %76 = vector.load %arg5[%c0_60, %c0_61] : memref<256x256xf32, #tpu.memory_space<vmem>>, vector<256x256xf32>
      %cst_62 = arith.constant dense<0.000000e+00> : vector<32x256xf32>
      %77 = tpu.matmul %75, %76, %cst_62 {dimension_numbers = #tpu.dot_dimension_numbers<[1], [0], [0], [1], [0, 0, 1, 1], [], []>} : vector<32x256xf32>, vector<256x256xf32>, vector<32x256xf32> -> vector<32x256xf32>
      %c0_63 = arith.constant 0 : index
      %c0_64 = arith.constant 0 : index
      %78 = vector.load %arg9[%c0_63, %c0_64] : memref<1x256xf32, #tpu.memory_space<vmem>>, vector<1x256xf32>
      %79 = vector.broadcast %78 : vector<1x256xf32> to vector<32x256xf32>
      %80 = arith.addf %77, %79 : vector<32x256xf32>
      %c0_65 = arith.constant 0 : index
      %c0_66 = arith.constant 0 : index
      %81 = vector.load %arg6[%c0_65, %c0_66] : memref<256x256xf32, #tpu.memory_space<vmem>>, vector<256x256xf32>
      %cst_67 = arith.constant dense<0.000000e+00> : vector<32x256xf32>
      %82 = tpu.matmul %75, %81, %cst_67 {dimension_numbers = #tpu.dot_dimension_numbers<[1], [0], [0], [1], [0, 0, 1, 1], [], []>} : vector<32x256xf32>, vector<256x256xf32>, vector<32x256xf32> -> vector<32x256xf32>
      %c0_68 = arith.constant 0 : index
      %c0_69 = arith.constant 0 : index
      %83 = vector.load %arg10[%c0_68, %c0_69] : memref<1x256xf32, #tpu.memory_space<vmem>>, vector<1x256xf32>
      %84 = vector.broadcast %83 : vector<1x256xf32> to vector<32x256xf32>
      %85 = arith.addf %82, %84 : vector<32x256xf32>
      %86 = vector.extract_strided_slice %80 {offsets = [0, 0], sizes = [32, 128], strides = [1, 1]} : vector<32x256xf32> to vector<32x128xf32>
      %c0_70 = arith.constant 0 : index
      %c0_71 = arith.constant 0 : index
      %c0_72 = arith.constant 0 : index
      %87 = vector.load %arg15[%c0_70, %c0_71, %c0_72] : memref<2x32x128xf32, #tpu.memory_space<vmem>>, vector<1x32x128xf32>
      %88 = vector.shape_cast %87 : vector<1x32x128xf32> to vector<32x128xf32>
      %89 = vector.shape_cast %86 : vector<32x128xf32> to vector<1x32x128xf32>
      tpu.vector_store %arg15[%c0_70, %c0_71, %c0_72], %89 {strides = array<i32>} : memref<2x32x128xf32, #tpu.memory_space<vmem>>, vector<1x32x128xf32>,
      %90 = vector.extract_strided_slice %85 {offsets = [0, 0], sizes = [32, 128], strides = [1, 1]} : vector<32x256xf32> to vector<32x128xf32>
      %c0_73 = arith.constant 0 : index
      %c0_74 = arith.constant 0 : index
      %c0_75 = arith.constant 0 : index
      %91 = vector.load %arg16[%c0_73, %c0_74, %c0_75] : memref<2x32x128xf32, #tpu.memory_space<vmem>>, vector<1x32x128xf32>
      %92 = vector.shape_cast %91 : vector<1x32x128xf32> to vector<32x128xf32>
      %93 = vector.shape_cast %90 : vector<32x128xf32> to vector<1x32x128xf32>
      tpu.vector_store %arg16[%c0_73, %c0_74, %c0_75], %93 {strides = array<i32>} : memref<2x32x128xf32, #tpu.memory_space<vmem>>, vector<1x32x128xf32>,
      %94 = vector.extract_strided_slice %80 {offsets = [0, 128], sizes = [32, 128], strides = [1, 1]} : vector<32x256xf32> to vector<32x128xf32>
      %c1_76 = arith.constant 1 : index
      %c0_77 = arith.constant 0 : index
      %c0_78 = arith.constant 0 : index
      %95 = vector.load %arg15[%c1_76, %c0_77, %c0_78] : memref<2x32x128xf32, #tpu.memory_space<vmem>>, vector<1x32x128xf32>
      %96 = vector.shape_cast %95 : vector<1x32x128xf32> to vector<32x128xf32>
      %97 = vector.shape_cast %94 : vector<32x128xf32> to vector<1x32x128xf32>
      tpu.vector_store %arg15[%c1_76, %c0_77, %c0_78], %97 {strides = array<i32>} : memref<2x32x128xf32, #tpu.memory_space<vmem>>, vector<1x32x128xf32>,
      %98 = vector.extract_strided_slice %85 {offsets = [0, 128], sizes = [32, 128], strides = [1, 1]} : vector<32x256xf32> to vector<32x128xf32>
      %c1_79 = arith.constant 1 : index
      %c0_80 = arith.constant 0 : index
      %c0_81 = arith.constant 0 : index
      %99 = vector.load %arg16[%c1_79, %c0_80, %c0_81] : memref<2x32x128xf32, #tpu.memory_space<vmem>>, vector<1x32x128xf32>
      %100 = vector.shape_cast %99 : vector<1x32x128xf32> to vector<32x128xf32>
      %101 = vector.shape_cast %98 : vector<32x128xf32> to vector<1x32x128xf32>
      tpu.vector_store %arg16[%c1_79, %c0_80, %c0_81], %101 {strides = array<i32>} : memref<2x32x128xf32, #tpu.memory_space<vmem>>, vector<1x32x128xf32>,
    } else {
    }
    %c0 = arith.constant 0 : index
    %c0_1 = arith.constant 0 : index
    %c0_2 = arith.constant 0 : index
    %3 = vector.load %arg3[%c0, %c0_1, %c0_2] : memref<1x16x256xf32, #tpu.memory_space<vmem>>, vector<1x16x256xf32>
    %4 = vector.shape_cast %3 : vector<1x16x256xf32> to vector<16x256xf32>
    %c0_3 = arith.constant 0 : index
    %c0_4 = arith.constant 0 : index
    %5 = vector.load %arg4[%c0_3, %c0_4] : memref<256x256xf32, #tpu.memory_space<vmem>>, vector<256x256xf32>
    %cst = arith.constant dense<0.000000e+00> : vector<16x256xf32>
    %6 = tpu.matmul %4, %5, %cst {dimension_numbers = #tpu.dot_dimension_numbers<[1], [0], [0], [1], [0, 0, 1, 1], [], []>} : vector<16x256xf32>, vector<256x256xf32>, vector<16x256xf32> -> vector<16x256xf32>
    %c0_5 = arith.constant 0 : index
    %c0_6 = arith.constant 0 : index
    %7 = vector.load %arg8[%c0_5, %c0_6] : memref<1x256xf32, #tpu.memory_space<vmem>>, vector<1x256xf32>
    %8 = vector.broadcast %7 : vector<1x256xf32> to vector<16x256xf32>
    %9 = arith.addf %6, %8 : vector<16x256xf32>
    %10 = vector.extract_strided_slice %9 {offsets = [0, 0], sizes = [16, 128], strides = [1, 1]} : vector<16x256xf32> to vector<16x128xf32>
    %c0_7 = arith.constant 0 : index
    %c0_8 = arith.constant 0 : index
    %c0_9 = arith.constant 0 : index
    %11 = vector.load %arg17[%c0_7, %c0_8, %c0_9] : memref<2x16x128xf32, #tpu.memory_space<vmem>>, vector<1x16x128xf32>
    %12 = vector.shape_cast %11 : vector<1x16x128xf32> to vector<16x128xf32>
    %13 = vector.shape_cast %10 : vector<16x128xf32> to vector<1x16x128xf32>
    tpu.vector_store %arg17[%c0_7, %c0_8, %c0_9], %13 {strides = array<i32>} : memref<2x16x128xf32, #tpu.memory_space<vmem>>, vector<1x16x128xf32>,
    %14 = vector.extract_strided_slice %9 {offsets = [0, 128], sizes = [16, 128], strides = [1, 1]} : vector<16x256xf32> to vector<16x128xf32>
    %c1 = arith.constant 1 : index
    %c0_10 = arith.constant 0 : index
    %c0_11 = arith.constant 0 : index
    %15 = vector.load %arg17[%c1, %c0_10, %c0_11] : memref<2x16x128xf32, #tpu.memory_space<vmem>>, vector<1x16x128xf32>
    %16 = vector.shape_cast %15 : vector<1x16x128xf32> to vector<16x128xf32>
    %17 = vector.shape_cast %14 : vector<16x128xf32> to vector<1x16x128xf32>
    tpu.vector_store %arg17[%c1, %c0_10, %c0_11], %17 {strides = array<i32>} : memref<2x16x128xf32, #tpu.memory_space<vmem>>, vector<1x16x128xf32>,
    %c0_12 = arith.constant 0 : index
    %c0_13 = arith.constant 0 : index
    %c0_14 = arith.constant 0 : index
    %18 = vector.load %arg17[%c0_12, %c0_13, %c0_14] : memref<2x16x128xf32, #tpu.memory_space<vmem>>, vector<2x16x128xf32>
    %c0_15 = arith.constant 0 : index
    %c0_16 = arith.constant 0 : index
    %c0_17 = arith.constant 0 : index
    %19 = vector.load %arg15[%c0_15, %c0_16, %c0_17] : memref<2x32x128xf32, #tpu.memory_space<vmem>>, vector<2x32x128xf32>
    "tpu.trace_start"() <{level = 10 : i32, message = "hqd,hkd->hqk"}> : () -> ()
    %cst_18 = arith.constant dense<0.000000e+00> : vector<2x16x32xf32>
    %20 = tpu.matmul %18, %19, %cst_18 {dimension_numbers = #tpu.dot_dimension_numbers<[2], [2], [1], [1], [0, 0, 0, 1, 1, 1], [0], [0]>} : vector<2x16x128xf32>, vector<2x32x128xf32>, vector<2x16x32xf32> -> vector<2x16x32xf32>
    "tpu.trace_stop"() : () -> ()
    %cst_19 = arith.constant 0.0883883461 : f32
    %21 = vector.broadcast %cst_19 : f32 to vector<2x16x32xf32>
    %22 = arith.mulf %20, %21 : vector<2x16x32xf32>
    %cst_20 = arith.constant dense<0xFF800000> : vector<2x16xf32>
    %23 = vector.multi_reduction <maximumf>, %22, %cst_20 [2] : vector<2x16x32xf32> to vector<2x16xf32>
    %24 = vector.shape_cast %23 : vector<2x16xf32> to vector<2x16x1xf32>
    %25 = vector.broadcast %24 : vector<2x16x1xf32> to vector<2x16x32xf32>
    %26 = arith.subf %22, %25 : vector<2x16x32xf32>
    %27 = math.exp %26 : vector<2x16x32xf32>
    %cst_21 = arith.constant dense<0.000000e+00> : vector<2x16xf32>
    %28 = vector.multi_reduction <add>, %27, %cst_21 [2] : vector<2x16x32xf32> to vector<2x16xf32>
    %29 = vector.shape_cast %28 : vector<2x16xf32> to vector<2x16x1xf32>
    %30 = tpu.reciprocal %29 : vector<2x16x1xf32> -> vector<2x16x1xf32>
    %31 = vector.broadcast %30 : vector<2x16x1xf32> to vector<2x16x32xf32>
    %32 = arith.mulf %27, %31 : vector<2x16x32xf32>
    %c0_22 = arith.constant 0 : index
    %c0_23 = arith.constant 0 : index
    %c0_24 = arith.constant 0 : index
    %33 = vector.load %arg16[%c0_22, %c0_23, %c0_24] : memref<2x32x128xf32, #tpu.memory_space<vmem>>, vector<2x32x128xf32>
    "tpu.trace_start"() <{level = 10 : i32, message = "hqk,hkd->hqd"}> : () -> ()
    %cst_25 = arith.constant dense<0.000000e+00> : vector<2x16x128xf32>
    %34 = tpu.matmul %32, %33, %cst_25 {dimension_numbers = #tpu.dot_dimension_numbers<[2], [1], [1], [2], [0, 0, 0, 1, 1, 2], [0], [0]>} : vector<2x16x32xf32>, vector<2x32x128xf32>, vector<2x16x128xf32> -> vector<2x16x128xf32>
    "tpu.trace_stop"() : () -> ()
    %c0_26 = arith.constant 0 : index
    %c0_27 = arith.constant 0 : index
    %c0_28 = arith.constant 0 : index
    %35 = vector.load %arg17[%c0_26, %c0_27, %c0_28] : memref<2x16x128xf32, #tpu.memory_space<vmem>>, vector<2x16x128xf32>
    tpu.vector_store %arg17[%c0_26, %c0_27, %c0_28], %34 {strides = array<i32>} : memref<2x16x128xf32, #tpu.memory_space<vmem>>, vector<2x16x128xf32>,
    %c0_29 = arith.constant 0 : index
    %c0_30 = arith.constant 0 : index
    %c0_31 = arith.constant 0 : index
    %36 = vector.load %arg17[%c0_29, %c0_30, %c0_31] : memref<2x16x128xf32, #tpu.memory_space<vmem>>, vector<1x16x128xf32>
    %37 = vector.shape_cast %36 : vector<1x16x128xf32> to vector<16x128xf32>
    %c0_32 = arith.constant 0 : index
    %c0_33 = arith.constant 0 : index
    %38 = vector.load %arg18[%c0_32, %c0_33] : memref<16x256xf32, #tpu.memory_space<vmem>>, vector<16x128xf32>
    tpu.vector_store %arg18[%c0_32, %c0_33], %37 {strides = array<i32>} : memref<16x256xf32, #tpu.memory_space<vmem>>, vector<16x128xf32>,
    %c1_34 = arith.constant 1 : index
    %c0_35 = arith.constant 0 : index
    %c0_36 = arith.constant 0 : index
    %39 = vector.load %arg17[%c1_34, %c0_35, %c0_36] : memref<2x16x128xf32, #tpu.memory_space<vmem>>, vector<1x16x128xf32>
    %40 = vector.shape_cast %39 : vector<1x16x128xf32> to vector<16x128xf32>
    %c0_37 = arith.constant 0 : index
    %c128 = arith.constant 128 : index
    %41 = vector.load %arg18[%c0_37, %c128] : memref<16x256xf32, #tpu.memory_space<vmem>>, vector<16x128xf32>
    tpu.vector_store %arg18[%c0_37, %c128], %40 {strides = array<i32>} : memref<16x256xf32, #tpu.memory_space<vmem>>, vector<16x128xf32>,
    %c0_38 = arith.constant 0 : index
    %c0_39 = arith.constant 0 : index
    %42 = vector.load %arg18[%c0_38, %c0_39] : memref<16x256xf32, #tpu.memory_space<vmem>>, vector<16x256xf32>
    %c0_40 = arith.constant 0 : index
    %c0_41 = arith.constant 0 : index
    %43 = vector.load %arg7[%c0_40, %c0_41] : memref<256x256xf32, #tpu.memory_space<vmem>>, vector<256x256xf32>
    %cst_42 = arith.constant dense<0.000000e+00> : vector<16x256xf32>
    %44 = tpu.matmul %42, %43, %cst_42 {dimension_numbers = #tpu.dot_dimension_numbers<[1], [0], [0], [1], [0, 0, 1, 1], [], []>} : vector<16x256xf32>, vector<256x256xf32>, vector<16x256xf32> -> vector<16x256xf32>
    %c0_43 = arith.constant 0 : index
    %c0_44 = arith.constant 0 : index
    %45 = vector.load %arg11[%c0_43, %c0_44] : memref<1x256xf32, #tpu.memory_space<vmem>>, vector<1x256xf32>
    %46 = vector.broadcast %45 : vector<1x256xf32> to vector<16x256xf32>
    %47 = arith.addf %44, %46 : vector<16x256xf32>
    %48 = arith.addf %4, %47 : vector<16x256xf32>
    %cst_45 = arith.constant dense<0.000000e+00> : vector<16xf32>
    %49 = vector.multi_reduction <add>, %48, %cst_45 [1] : vector<16x256xf32> to vector<16xf32>
    %50 = vector.shape_cast %49 : vector<16xf32> to vector<16x1xf32>
    %cst_46 = arith.constant 2.560000e+02 : f32
    %51 = vector.broadcast %cst_46 : f32 to vector<16x1xf32>
    %52 = arith.divf %50, %51 : vector<16x1xf32>
    %53 = vector.broadcast %52 : vector<16x1xf32> to vector<16x256xf32>
    %54 = arith.subf %48, %53 : vector<16x256xf32>
    %55 = arith.mulf %54, %54 : vector<16x256xf32>
    %cst_47 = arith.constant dense<0.000000e+00> : vector<16xf32>
    %56 = vector.multi_reduction <add>, %55, %cst_47 [1] : vector<16x256xf32> to vector<16xf32>
    %57 = vector.shape_cast %56 : vector<16xf32> to vector<16x1xf32>
    %cst_48 = arith.constant 2.560000e+02 : f32
    %58 = vector.broadcast %cst_48 : f32 to vector<16x1xf32>
    %59 = arith.divf %57, %58 : vector<16x1xf32>
    %cst_49 = arith.constant 9.99999974E-6 : f32
    %60 = vector.broadcast %cst_49 : f32 to vector<16x1xf32>
    %61 = arith.addf %59, %60 : vector<16x1xf32>
    %62 = math.rsqrt %61 : vector<16x1xf32>
    %63 = vector.broadcast %62 : vector<16x1xf32> to vector<16x256xf32>
    %64 = arith.mulf %54, %63 : vector<16x256xf32>
    %c0_50 = arith.constant 0 : index
    %c0_51 = arith.constant 0 : index
    %65 = vector.load %arg12[%c0_50, %c0_51] : memref<1x256xf32, #tpu.memory_space<vmem>>, vector<1x256xf32>
    %66 = vector.broadcast %65 : vector<1x256xf32> to vector<16x256xf32>
    %67 = arith.mulf %64, %66 : vector<16x256xf32>
    %c0_52 = arith.constant 0 : index
    %c0_53 = arith.constant 0 : index
    %68 = vector.load %arg13[%c0_52, %c0_53] : memref<1x256xf32, #tpu.memory_space<vmem>>, vector<1x256xf32>
    %69 = vector.broadcast %68 : vector<1x256xf32> to vector<16x256xf32>
    %70 = arith.addf %67, %69 : vector<16x256xf32>
    %c0_54 = arith.constant 0 : index
    %c0_55 = arith.constant 0 : index
    %c0_56 = arith.constant 0 : index
    %71 = vector.load %arg14[%c0_54, %c0_55, %c0_56] : memref<1x16x256xf32, #tpu.memory_space<vmem>>, vector<1x16x256xf32>
    %72 = vector.shape_cast %71 : vector<1x16x256xf32> to vector<16x256xf32>
    %73 = vector.shape_cast %70 : vector<16x256xf32> to vector<1x16x256xf32>
    tpu.vector_store %arg14[%c0_54, %c0_55, %c0_56], %73 {strides = array<i32>} : memref<1x16x256xf32, #tpu.memory_space<vmem>>, vector<1x16x256xf32>,
    return
  }
  func.func @transform_0(%arg0: i32, %arg1: i32) -> (i32, i32, i32) {
    %c0_i32 = arith.constant 0 : i32
    %c0_i32_0 = arith.constant 0 : i32
    %c0_i32_1 = arith.constant 0 : i32
    return %arg0, %c0_i32, %c0_i32_0 : i32, i32, i32
  }
  func.func @transform_1(%arg0: i32, %arg1: i32) -> (i32, i32, i32) {
    %c0_i32 = arith.constant 0 : i32
    %c0_i32_0 = arith.constant 0 : i32
    return %arg0, %arg1, %c0_i32 : i32, i32, i32
  }
  func.func @transform_2(%arg0: i32, %arg1: i32) -> (i32, i32) {
    %c0_i32 = arith.constant 0 : i32
    %c0_i32_0 = arith.constant 0 : i32
    %c0_i32_1 = arith.constant 0 : i32
    return %c0_i32, %c0_i32_0 : i32, i32
  }
  func.func @transform_3(%arg0: i32, %arg1: i32) -> (i32, i32) {
    %c0_i32 = arith.constant 0 : i32
    %c0_i32_0 = arith.constant 0 : i32
    %c0_i32_1 = arith.constant 0 : i32
    return %c0_i32, %c0_i32_0 : i32, i32
  }
  func.func @transform_4(%arg0: i32, %arg1: i32) -> (i32, i32) {
    %c0_i32 = arith.constant 0 : i32
    %c0_i32_0 = arith.constant 0 : i32
    %c0_i32_1 = arith.constant 0 : i32
    return %c0_i32, %c0_i32_0 : i32, i32
  }
  func.func @transform_5(%arg0: i32, %arg1: i32) -> (i32, i32) {
    %c0_i32 = arith.constant 0 : i32
    %c0_i32_0 = arith.constant 0 : i32
    %c0_i32_1 = arith.constant 0 : i32
    return %c0_i32, %c0_i32_0 : i32, i32
  }
  func.func @transform_6(%arg0: i32, %arg1: i32) -> (i32, i32) {
    %c0_i32 = arith.constant 0 : i32
    %c0_i32_0 = arith.constant 0 : i32
    %c0_i32_1 = arith.constant 0 : i32
    return %c0_i32, %c0_i32_0 : i32, i32
  }
  func.func @transform_7(%arg0: i32, %arg1: i32) -> (i32, i32) {
    %c0_i32 = arith.constant 0 : i32
    %c0_i32_0 = arith.constant 0 : i32
    %c0_i32_1 = arith.constant 0 : i32
    return %c0_i32, %c0_i32_0 : i32, i32
  }
  func.func @transform_8(%arg0: i32, %arg1: i32) -> (i32, i32) {
    %c0_i32 = arith.constant 0 : i32
    %c0_i32_0 = arith.constant 0 : i32
    %c0_i32_1 = arith.constant 0 : i32
    return %c0_i32, %c0_i32_0 : i32, i32
  }
  func.func @transform_9(%arg0: i32, %arg1: i32) -> (i32, i32) {
    %c0_i32 = arith.constant 0 : i32
    %c0_i32_0 = arith.constant 0 : i32
    %c0_i32_1 = arith.constant 0 : i32
    return %c0_i32, %c0_i32_0 : i32, i32
  }
  func.func @transform_10(%arg0: i32, %arg1: i32) -> (i32, i32) {
    %c0_i32 = arith.constant 0 : i32
    %c0_i32_0 = arith.constant 0 : i32
    %c0_i32_1 = arith.constant 0 : i32
    return %c0_i32, %c0_i32_0 : i32, i32
  }
  func.func @transform_11(%arg0: i32, %arg1: i32) -> (i32, i32) {
    %c0_i32 = arith.constant 0 : i32
    %c0_i32_0 = arith.constant 0 : i32
    %c0_i32_1 = arith.constant 0 : i32
    return %c0_i32, %c0_i32_0 : i32, i32
  }
  func.func @transform_12(%arg0: i32, %arg1: i32) -> (i32, i32, i32) {
    %c0_i32 = arith.constant 0 : i32
    %c0_i32_0 = arith.constant 0 : i32
    return %arg0, %arg1, %c0_i32 : i32, i32, i32
  }
}

</mosaic_0001>

<bundles_post_ra>
// kernel: tpu_custom_call.1
= control target key start
LH: loop header
LB: loop body
LE: loop exit
PB: predicated region body
PF: predicated region fallthrough
CT: control target
= control target key end

     0   :  { %s2919_s0 = inlined_call_operand.hbm [shape: f32[2,32,256], index: 0, kind: input, shape index: {}]   ;;  %s2920_s1 = inlined_call_operand.hbm [shape: f32[2,32,256], index: 1, kind: input, shape index: {}]   ;;  %s2921_s2 = inlined_call_operand.hbm [shape: f32[256,256], index: 2, kind: input, shape index: {}]   ;;  %s2922_s3 = inlined_call_operand.hbm [shape: f32[256,256], index: 3, kind: input, shape index: {}]   ;;  %s2923_s4 = inlined_call_operand.hbm [shape: f32[256,256], index: 4, kind: input, shape index: {}]   ;;  %s2924_s5 = inlined_call_operand.hbm [shape: f32[256,256], index: 5, kind: input, shape index: {}]   ;;  %s2925_s6 = inlined_call_operand.vmem [shape: f32[1,256], index: 6, kind: input, shape index: {}]   ;;  %s2926_s7 = inlined_call_operand.vmem [shape: f32[1,256], index: 7, kind: input, shape index: {}]   ;;  %s2927_s8 = inlined_call_operand.vmem [shape: f32[1,256], index: 8, kind: input, shape index: {}]   ;;  %s2928_s9 = inlined_call_operand.vmem [shape: f32[1,256], index: 9, kind: input, shape index: {}]   ;;  %s2929_s10 = inlined_call_operand.vmem [shape: f32[1,256], index: 10, kind: input, shape index: {}]   ;;  %s2930_s11 = inlined_call_operand.vmem [shape: f32[1,256], index: 11, kind: input, shape index: {}]   ;;  %s2931_s12 = inlined_call_operand.hbm [shape: f32[2,32,256], index: 12, kind: output, shape index: {}]  }
   0x1   :  { %2952 = sst [smem:[#allocation34_spill]] %s2919_s0 }
   0x2   :  { %2953 = sst [smem:[#allocation35_spill]] %s2921_s2 }
   0x3   :  { %2954 = sst [smem:[#allocation36_spill]] %s2922_s3 }
   0x4   :  { %2955 = sst [smem:[#allocation37_spill]] %s2923_s4 }
   0x5   :  { %2956 = sst [smem:[#allocation38_spill]] %s2924_s5 }
   0x6   :  { %2957 = sst [smem:[#allocation39_spill]] %s2925_s6 }
   0x7   :  { %2958 = sst [smem:[#allocation40_spill]] %s2926_s7 }
   0x8   :  { %2959 = sst [smem:[#allocation41_spill]] %s2927_s8 }
   0x9   :  { %2960 = sst [smem:[#allocation42_spill]] %s2928_s9 }
   0xa   :  { %2961 = sst [smem:[#allocation43_spill]] %s2929_s10 }
   0xb   :  { %2962 = sst [smem:[#allocation44_spill]] %s2930_s11 }
   0xc   :  { %2963 = sst [smem:[#allocation45_spill]] %s2931_s12 }
   0xd   :  { %17 = vsyncpa [#allocation7], 0 }
   0xe   :  { %19 = vsyncpa [#allocation7 + $0x1], 0 }
   0xf   :  { %20 = vsyncpa [#allocation10], 0 }
  0x10   :  { %22 = vsyncpa [#allocation10 + $0x1], 0 }
  0x11   :  { %23 = vsyncpa [#allocation13], 0 }
  0x12   :  { %24 = vsyncpa [#allocation16], 0 }
  0x13   :  { %25 = vsyncpa [#allocation8], 0 }
  0x14   :  { %27 = vsyncpa [#allocation8 + $0x1], 0  ;;  %s2517_s21 = smov 0   ;;  %s2519_s22 = smov 0  }
  0x15   :  { %s2521_s23 = smov 0   ;;  %s2523_s24 = smov 0  }
  0x16   :  { %s2525_s25 = smov 0   ;;  %s2527_s26 = smov 0  }
  0x17   :  { %s2529_s27 = smov 0   ;;  %s2531_s28 = smov 0  }
  0x18   :  { %s2533_s29 = smov 0   ;;  %s2535_s30 = smov 0  }
  0x19   :  { %s2537_s13 = smov 0  }
  0x1a LB: > { %2964 = sst [smem:[#allocation24_spill]] %s2399_s21  ;;  %s2573_s14 = sadd.s32 4294967295, %s2439_s13   ;;  %s2439_s13 = sphi %s2537_s13, %s33_s13   ;;  %s2435_s30 = sphi %s2535_s30, %s3029_s30   ;;  %s2431_s29 = sphi %s2533_s29, %s3028_s29   ;;  %s2427_s28 = sphi %s2531_s28, %s3027_s28   ;;  %s2423_s27 = sphi %s2529_s27, %s3026_s27   ;;  %s2419_s26 = sphi %s2527_s26, %s3025_s26   ;;  %s2415_s25 = sphi %s2525_s25, %s3024_s25   ;;  %s2411_s24 = sphi %s2523_s24, %s3023_s24   ;;  %s2407_s23 = sphi %s2521_s23, %s3022_s23   ;;  %s2403_s22 = sphi %s2519_s22, %s3021_s22   ;;  %s2399_s21 = sphi %s2517_s21, %s3018_s21  }
  0x1b   : > { %2965 = sst [smem:[#allocation25_spill]] %s2403_s22  ;;  %s1865_s15 = sadd.s32 4294967294, %s2439_s13  }
  0x1c   : > { %2966 = sst [smem:[#allocation26_spill]] %s2423_s27  ;;  %p2939_p0 = scmp.eq.s32.totalorder %s2573_s14, 0 }
  0x1d   : > { %2967 = sst [smem:[#allocation27_spill]] %s2427_s28  ;;  %p93_p1 = scmp.ne.s32.totalorder %s2403_s22, %s2399_s21 }
  0x1e   : > { %2968 = sst [smem:[#allocation28_spill]] %s2573_s14  ;;  %p335_p2 = scmp.eq.s32.totalorder %s1865_s15, 3 }
  0x1f   : > { %p2581_p3 = por %p93_p1, %p2939_p0  ;;  %p1866_p4 = scmp.ge.s32.totalorder %s2439_s13, 1 }
  0x20   : > { %p2586_p5 = por %p335_p2, %p93_p1  ;;  %p342_p6 = scmp.lt.s32.totalorder %s2439_s13, 5 }
  0x21   : > { %s2969_s16 = scalar_select %p2581_p3, 1, 0 }
  0x22   : > { %s2971_s17 = scalar_select %p2586_p5, 1, 0 }
  0x23   : > { %2970 = sst [smem:[#allocation29_spill]] %s2969_s16  ;;  %p2591_p7 = pnand %p1866_p4, %p342_p6 }
  0x24   : > { %2972 = sst [smem:[#allocation30_spill]] %s2971_s17  ;;  %s2441_s19 = smov [#allocation11]  }
  0x25   : > { %s354_s20 = sshll.u32 %s2441_s19, 4  ;;  %p1993_p8 = pneg %p2591_p7  ;;  %s355_s20 = int_to_ptr.vmem [resolvable:$true] %s354_s20 }
  0x26   : > { %s2442_s21 = smov [#allocation12]   ;;  %s2443_s12 = smov [#allocation14]  }
  0x27   : > { %p2599_p9 = pnand %p1993_p8, %p2939_p0  ;;  %s367_s17 = sshll.u32 %s2442_s21, 4  ;;  %s368_s17 = int_to_ptr.vmem [resolvable:$true] %s367_s17 }
  0x28   : > { %s380_s11 = sshll.u32 %s2443_s12, 4  ;;  %s2154_s10 = scalar_lea.vmem %s355_s20, 8192  ;;  %s381_s11 = int_to_ptr.vmem [resolvable:$true] %s380_s11 }
  0x29   : > { %p2145_p10 = pneg %p2599_p9  ;;  %p2155_p11 = scmp.ne.s32.totalorder %s355_s20, %s2154_s10 }
  0x2a   : > { %p2162_p1 = scmp.lt.s32.totalorder %s355_s20, %s355_s20  ;;  %p2163_p2 = scmp.lt.s32.totalorder %s2154_s10, %s2154_s10 }
  0x2b   : > { %p2157_p12 = pnand %p2155_p11, %p2145_p10 }
  0x2c   : > { %p2164_p4 = por %p2163_p2, %p2162_p1 }
  0x2d   : > { %p2158_p13 = pneg %p2157_p12 }
  0x2f   : > { %p2165_p6 = pnand %p2164_p4, %p2158_p13 }
  0x31   : > { %2168 = shalt.err (!%p2165_p6)
}
  0x32   : > { %s2935_s19 = smov 256   ;;  %s2937_s21 = smov 16  }
  0x33   : > { %s2975_s2 = sld [smem:[#allocation35_spill]]  ;;  %s2180_s9 = scalar_lea.vmem %s368_s17, 8192 }
  0x34   : > { %p2181_p8 = scmp.ne.s32.totalorder %s368_s17, %s2180_s9  ;;  %p2188_p13 = scmp.lt.s32.totalorder %s368_s17, %s368_s17 }
  0x35   : > { %p2189_p1 = scmp.lt.s32.totalorder %s2180_s9, %s2180_s9 }
  0x36   : > { %p2183_p11 = pnand %p2181_p8, %p2145_p10 }
  0x37   : > { %p2190_p2 = por %p2189_p1, %p2188_p13 }
  0x38   : > { %p2184_p12 = pneg %p2183_p11 }
  0x39   : > { %1996 = dma.hbm_to_vmem [thread:$0]  (!%p2599_p9), %s2975_s2, 8192, %s355_s20, [#allocation10], %s2935_s19, %s2935_s19, %s2937_s21  }
  0x3a   : > { %p2191_p4 = pnand %p2190_p2, %p2184_p12 }
  0x3c   : > { %2194 = shalt.err (!%p2191_p4)
}
  0x3d   : > { %s2976_s3 = sld [smem:[#allocation36_spill]]  ;;  %s2206_s28 = scalar_lea.vmem %s381_s11, 8192 }
  0x3e   : > { %p2207_p6 = scmp.ne.s32.totalorder %s381_s11, %s2206_s28  ;;  %p2214_p13 = scmp.lt.s32.totalorder %s381_s11, %s381_s11 }
  0x3f   : > { %p2215_p12 = scmp.lt.s32.totalorder %s2206_s28, %s2206_s28 }
  0x40   : > { %p2209_p8 = pnand %p2207_p6, %p2145_p10 }
  0x41   : > { %p2216_p1 = por %p2215_p12, %p2214_p13 }
  0x42   : > { %p2210_p11 = pneg %p2209_p8 }
  0x43   : > { %1999 = dma.hbm_to_vmem [thread:$0]  (!%p2599_p9), %s2976_s3, 8192, %s368_s17, [#allocation13], %s2935_s19, %s2935_s19, %s2937_s21  }
  0x44   : > { %p2217_p2 = pnand %p2216_p1, %p2210_p11 }
  0x46   : > { %2220 = shalt.err (!%p2217_p2)
}
  0x47   : > { %s2977_s4 = sld [smem:[#allocation37_spill]]  ;;  %s2446_s17 = smov [#allocation15]  }
  0x48   : > { %s393_s20 = sshll.u32 %s2446_s17, 4  ;;  %s394_s20 = int_to_ptr.vmem [resolvable:$true] %s393_s20 }
  0x49   : > { %s2232_s12 = scalar_lea.vmem %s394_s20, 8192  ;;  %p2240_p11 = scmp.lt.s32.totalorder %s394_s20, %s394_s20 }
  0x4a   : > { %p2233_p4 = scmp.ne.s32.totalorder %s394_s20, %s2232_s12  ;;  %p2241_p13 = scmp.lt.s32.totalorder %s2232_s12, %s2232_s12 }
  0x4c   : > { %p2235_p6 = pnand %p2233_p4, %p2145_p10  ;;  %p2242_p12 = por %p2241_p13, %p2240_p11 }
  0x4d   : > { %2002 = dma.hbm_to_vmem [thread:$0]  (!%p2599_p9), %s2977_s4, 8192, %s381_s11, [#allocation13], %s2935_s19, %s2935_s19, %s2937_s21  }
  0x4e   : > { %p2236_p8 = pneg %p2235_p6 }
  0x50   : > { %p2243_p1 = pnand %p2242_p12, %p2236_p8 }
  0x52   : > { %2246 = shalt.err (!%p2243_p1)
}
  0x53   : > { %s2978_s5 = sld [smem:[#allocation38_spill]]  ;;  %p59_p2 = scmp.ne.s32.totalorder %s2419_s26, %s2415_s25 }
  0x54   : > { %p2940_p4 = scmp.eq.s32.totalorder %s2439_s13, 0  ;;  %p65_p6 = scmp.ne.s32.totalorder %s2415_s25, %s2411_s24 }
  0x55   : > { %p2021_p8 = scmp.lt.s32.totalorder %s2439_s13, 4  ;;  %s425_s28 = sand.u32 1, %s2419_s26  }
  0x56   : > { %p61_p11 = por %p2940_p4, %p59_p2  ;;  %p2662_p13 = por %p2939_p0, %p65_p6 }
  0x57   : > { %s1872_s9 = sshll.u32 %s425_s28, 6  ;;  %s1900_s17 = sshll.u32 %s2435_s30, 10 }
  0x58   : > { %s2980_s0 = sld [smem:[#allocation34_spill]]  ;;  %s429_s10 = scalar_lea.vmem [#allocation6], %s1872_s9 }
  0x59   : > { %2005 = dma.hbm_to_vmem [thread:$0]  (!%p2599_p9), %s2978_s5, 8192, %s394_s20, [#allocation16], %s2935_s19, %s2935_s19, %s2937_s21  }
  0x5a   : > { %s436_s15 = sshll.u32 %s429_s10, 4  ;;  %p2672_p9 = pnand %p2021_p8, %p61_p11  ;;  %s437_s15 = int_to_ptr.vmem [resolvable:$true] %s436_s15 }
  0x5b   : > { %s426_s19 = scalar_lea.sflag [#allocation7], %s425_s28  ;;  %s2260_s21 = scalar_lea.vmem %s437_s15, 1024 }
  0x5c   : > { %p2249_p12 = pneg %p2672_p9  ;;  %p2261_p1 = scmp.ne.s32.totalorder %s437_s15, %s2260_s21 }
  0x5d   : > { %s2447_s2 = smov [#allocation6]  }
  0x5e   : > { %s435_s20 = scalar_lea.hbm %s2980_s0, %s1900_s17  ;;  %p2263_p2 = pnand %p2261_p1, %p2249_p12 }
  0x5f   : > { %s2265_s3 = sshll.u32 %s2447_s2, 4  ;;  %s2266_s3 = int_to_ptr.vmem [resolvable:$false] %s2265_s3 }
  0x60   : > { %p2264_p6 = pneg %p2263_p2  ;;  %s2267_s17 = scalar_lea.vmem %s2266_s3, 2048 }
  0x61   : > { %p2268_p0 = scmp.lt.s32.totalorder %s437_s15, %s2266_s3  ;;  %p2269_p4 = scmp.lt.s32.totalorder %s2267_s17, %s2260_s21 }
  0x63   : > { %p2270_p10 = por %p2269_p4, %p2268_p0 }
  0x65   : > { %p2271_p11 = pnand %p2270_p10, %p2264_p6 }
  0x67   : > { %2274 = shalt.err (!%p2271_p11)
}
  0x68   : > { %s2982_s9 = smov 16   ;;  %s2983_s12 = smov 256  }
  0x69   : > { %2009 = dma.hbm_to_vmem [thread:$0]  (!%p2672_p9), %s435_s20, 1024, %s437_s15, %s426_s19, %s2983_s12, %s2983_s12, %s2982_s9  }
  0x6a   : > { %s52_s2 = sadd.s32 1, %s2419_s26  ;;  %s42_s3 = sadd.s32 1, %s2431_s29 }
  0x6b   : > { %p43_p0 = scmp.ge.s32.totalorder %s42_s3, 2  ;;  %s80_s21 = sadd.s32 1, %s2407_s23 }
  0x6c   : > { %p87_p10 = scmp.ne.s32.totalorder %s2407_s23, %s2403_s22  ;;  %s448_s28 = sand.u32 1, %s2407_s23  }
  0x6d   : > { %s3031_s3 = smov (%p43_p0, %s42_s3), 0  ;;  %s2985_s11 = sadd.s32 1, %s2435_s30 }
  0x6e   : > { %2984 = sst [smem:[#allocation31_spill]] %s3031_s3  ;;  %s3033_s11 = smov (!%p43_p0, %s2985_s11), %s2435_s30 }
  0x6f   : > { %s76_s10 = ssub.s32 %s2431_s29, %s3031_s3  ;;  %s446_s24 = sand.u32 1, %s2439_s13  }
  0x70   : > { %p47_p4 = scmp.ge.s32.totalorder %s3033_s11, 2  ;;  %p2986_p9 = scmp.eq.s32.totalorder %s2573_s14, 3 }
  0x71   : > { %p2989_p1 = scmp.eq.s32.totalorder %s2439_s13, 0  ;;  %s1875_s20 = sshll.u32 %s448_s28, 5 }
  0x72   : > { %p2699_p12 = por %p2986_p9, %p87_p10  ;;  %s3035_s11 = smov (%p47_p4, %s3033_s11), 0 }
  0x73   : > { %p2705_p2 = por %p87_p10, %p2989_p1  ;;  %2991 = sst [smem:[#allocation33_spill]] %s3035_s11 }
  0x74   : > { %s2987_s19 = scalar_select %p2699_p12, 1, 0 }
  0x75   : > { %s1901_s17 = sshll.u32 %s2431_s29, 2  ;;  %s49_s0 = ssub.s32 %s2435_s30, %s3035_s11 }
  0x76   : > { %2988 = sst [smem:[#allocation32_spill]] %s2987_s19  ;;  %s1878_s4 = sshll.u32 %s2435_s30, 3 }
  0x77   : > { %p50_p6 = scmp.eq.s32.totalorder %s49_s0, 0  ;;  %s77_s5 = sor.u32 %s76_s10, %s49_s0 }
  0x78   : > { %p78_p11 = scmp.eq.s32.totalorder %s77_s5, 0  ;;  %s457_s3 = sadd.s32 %s1901_s17, %s1878_s4 }
  0x79   : > { %s2716_s8 = scalar_select %p50_p6, %s2419_s26, %s52_s2  }
  0x7a   : > { %s2719_s19 = scalar_select %p78_p11, %s2407_s23, %s80_s21  }
  0x7b   : > { %s1879_s7 = sshll.u32 %s457_s3, 7  ;;  %s450_s27 = scalar_lea.vmem [#allocation9], %s1875_s20 }
  0x7c   : > { %s460_s16 = sshll.u32 %s450_s27, 4  ;;  %s459_s14 = scalar_lea.hbm %s2920_s1, %s1879_s7  ;;  %s461_s16 = int_to_ptr.vmem [resolvable:$true] %s460_s16 }
  0x7d   : > { %p2728_p0 = pnand %p2021_p8, %p2705_p2  ;;  %s447_s0 = scalar_lea.sflag [#allocation10], %s446_s24 }
  0x7e   : > { %s2288_s4 = scalar_lea.vmem %s461_s16, 512  ;;  %s2448_s5 = smov [#allocation9]  }
  0x7f   : > { %p2277_p10 = pneg %p2728_p0  ;;  %p2289_p4 = scmp.ne.s32.totalorder %s461_s16, %s2288_s4 }
  0x80   : > { %s2293_s27 = sshll.u32 %s2448_s5, 4  ;;  %s2294_s27 = int_to_ptr.vmem [resolvable:$false] %s2293_s27 }
  0x81   : > { %p2291_p9 = pnand %p2289_p4, %p2277_p10  ;;  %s2295_s22 = scalar_lea.vmem %s2294_s27, 1024 }
  0x82   : > { %p2296_p6 = scmp.lt.s32.totalorder %s461_s16, %s2294_s27  ;;  %p2297_p11 = scmp.lt.s32.totalorder %s2295_s22, %s2288_s4 }
  0x83   : > { %p2292_p1 = pneg %p2291_p9 }
  0x84   : > { %p2298_p5 = por %p2297_p11, %p2296_p6 }
  0x86   : > { %p2299_p12 = pnand %p2298_p5, %p2292_p1 }
  0x88   : > { %2302 = shalt.err (!%p2299_p12)
}
  0x89   : > { %2012 = dma.hbm_to_vmem [thread:$0]  (!%p2728_p0), %s459_s14, 512, %s461_s16, %s447_s0, %s2983_s12, %s2983_s12, %s2982_s9  }
  0x8a   : > { %472 = sbr.rel (%p2591_p7) target bundleno = 1959 (0x7a7), region = 68  ;;  %s474_s7 = sand.u32 (!%p2591_p7), 1, %s2415_s25  }
  0x8b   : > { %s1881_s2 = sshll.u32 (!%p2591_p7), %s474_s7, 6  ;;  %s475_s3 = scalar_lea.sflag (!%p2591_p7), [#allocation7], %s474_s7 }
  0x8c   : > { %s2742_s21 = scalar_lea.vmem (!%p2591_p7), [#allocation6], %s1881_s2 }
  0x8f   : > { %2374 = dma.done.wait (%p2662_p13), %s475_s3, 1024  }
  0x90   : > { %2376 = vsyncadd (%p2662_p13), %s475_s3, 4294966272  ;;  %s2993_s11 = sld [smem:[#allocation28_spill]] }
  0x91   : > { %s2994_s10 = sld [smem:[#allocation25_spill]] }
  0x96   : > { %s483_s14 = sand.u32 1, %s2993_s11  }
  0x97   : > { %s485_s16 = sand.u32 1, %s2994_s10   ;;  %s484_s9 = scalar_lea.sflag [#allocation10], %s483_s14 }
  0x98   : > { %s1882_s18 = sshll.u32 %s485_s16, 5 }
  0x99   : > { %s2752_s12 = scalar_lea.vmem [#allocation9], %s1882_s18 }
  0x9a   : > { %2378 = dma.done.wait (%p2581_p3), %s484_s9, 512  }
  0x9b   : > { %2380 = vsyncadd (%p2581_p3), %s484_s9, 4294966784  ;;  %p2996_p5 = scmp.eq.s32.totalorder %s2993_s11, 0 }
  0x9d   : > { %2382 = dma.done.wait (%p2996_p5), [#allocation10], 8192   ;;  %p2997_p7 = pmov %p2996_p5 }
  0x9e   : > { %p2998_p8 = pmov %p2996_p5 }
  0x9f   : > { %2384 = vsyncadd (%p2997_p7), [#allocation10], 4294959104 }
  0xa0   : > { %2386 = dma.done.wait (%p2998_p8), [#allocation13], 16384   ;;  %p2999_p13 = pmov %p2996_p5 }
  0xa1   : > { %p3000_p12 = pmov %p2996_p5 }
  0xa2   : > { %2388 = vsyncadd (%p2999_p13), [#allocation13], 4294950912 }
  0xa3   : > { %2390 = dma.done.wait (%p3000_p12), [#allocation16], 8192   ;;  %p3001_p2 = pmov %p2996_p5 }
  0xa4   : > { %s2770_s6 = scalar_lea.vmem [#allocation17], %s1882_s18  ;;  %s3002_s15 = sld [smem:[#allocation26_spill]] }
  0xa5   : > { %2392 = vsyncadd (%p3001_p2), [#allocation16], 4294959104 }
  0xaa   : > { %p1888_p3 = scmp.ne.s32.totalorder %s3002_s15, 0 }
  0xab   : > { %s3003_s28 = sld [smem:[#allocation40_spill]] (!%p1888_p3) }
  0xac   : > { %554 = sbr.rel (%p1888_p3) target bundleno = 454 (0x1c6), region = 96  ;;  %s3004_s5 = sld [smem:[#allocation41_spill]] (!%p1888_p3) }
  0xb1   : > { %v594_v0 = vld [vmem:[#allocation12 + $0xf8] sm:$0xff]  ;;  %v593_v2 = vld [vmem:[#allocation12 + $0xf0] sm:$0xff]  ;;  %v592_v4 = vld [vmem:[#allocation12 + $0xe8] sm:$0xff] }
  0xb2   : > { %v759_v1 = vld [vmem:[#allocation14 + $0xf8] sm:$0xff]  ;;  %639 = vmatprep.subr.mxu0 %v594_v0  ;;  %v758_v3 = vld [vmem:[#allocation14 + $0xf0] sm:$0xff]  ;;  %v757_v5 = vld [vmem:[#allocation14 + $0xe8] sm:$0xff] }
  0xb3   : > { %804 = vmatprep.subr.mxu1 %v759_v1  ;;  %640 = vmatpush1.msra.mxu0 %v593_v2  ;;  %v591_v6 = vld [vmem:[#allocation12 + $0xe0] sm:$0xff]  ;;  %v590_v8 = vld [vmem:[#allocation12 + $0xd8] sm:$0xff]  ;;  %v589_v10 = vld [vmem:[#allocation12 + $0xd0] sm:$0xff] }
  0xb4   : > { %805 = vmatpush1.msra.mxu1 %v758_v3  ;;  %v756_v7 = vld [vmem:[#allocation14 + $0xe0] sm:$0xff]  ;;  %641 = vmatprep.subr.mxu0 %v592_v4  ;;  %v755_v9 = vld [vmem:[#allocation14 + $0xd8] sm:$0xff]  ;;  %v754_v11 = vld [vmem:[#allocation14 + $0xd0] sm:$0xff] }
  0xb5   : > { %806 = vmatprep.subr.mxu1 %v757_v5  ;;  %642 = vmatpush1.msra.mxu0 %v591_v6  ;;  %v588_v12 = vld [vmem:[#allocation12 + $0xc8] sm:$0xff]  ;;  %v587_v14 = vld [vmem:[#allocation12 + $0xc0] sm:$0xff]  ;;  %v586_v16 = vld [vmem:[#allocation12 + $0xb8] sm:$0xff] }
  0xb6   : > { %807 = vmatpush1.msra.mxu1 %v756_v7  ;;  %v753_v13 = vld [vmem:[#allocation14 + $0xc8] sm:$0xff]  ;;  %643 = vmatprep.subr.mxu0 %v590_v8  ;;  %v752_v15 = vld [vmem:[#allocation14 + $0xc0] sm:$0xff]  ;;  %v751_v17 = vld [vmem:[#allocation14 + $0xb8] sm:$0xff] }
  0xb7   : > { %808 = vmatprep.subr.mxu1 %v755_v9  ;;  %644 = vmatpush1.msra.mxu0 %v589_v10  ;;  %v585_v18 = vld [vmem:[#allocation12 + $0xb0] sm:$0xff]  ;;  %v584_v20 = vld [vmem:[#allocation12 + $0xa8] sm:$0xff]  ;;  %v583_v22 = vld [vmem:[#allocation12 + $0xa0] sm:$0xff] }
  0xb8   : > { %809 = vmatpush1.msra.mxu1 %v754_v11  ;;  %645 = vmatprep.subr.mxu0 %v588_v12  ;;  %v750_v19 = vld [vmem:[#allocation14 + $0xb0] sm:$0xff]  ;;  %v749_v21 = vld [vmem:[#allocation14 + $0xa8] sm:$0xff]  ;;  %v748_v23 = vld [vmem:[#allocation14 + $0xa0] sm:$0xff] }
  0xb9   : > { %810 = vmatprep.subr.mxu1 %v753_v13  ;;  %646 = vmatpush1.msra.mxu0 %v587_v14  ;;  %v582_v24 = vld [vmem:[#allocation12 + $0x98] sm:$0xff]  ;;  %v581_v26 = vld [vmem:[#allocation12 + $0x90] sm:$0xff]  ;;  %v580_v28 = vld [vmem:[#allocation12 + $0x88] sm:$0xff] }
  0xba   : > { %811 = vmatpush1.msra.mxu1 %v752_v15  ;;  %647 = vmatprep.subr.mxu0 %v586_v16  ;;  %v747_v25 = vld [vmem:[#allocation14 + $0x98] sm:$0xff]  ;;  %v746_v27 = vld [vmem:[#allocation14 + $0x90] sm:$0xff]  ;;  %v745_v29 = vld [vmem:[#allocation14 + $0x88] sm:$0xff] }
  0xbb   : > { %812 = vmatprep.subr.mxu1 %v751_v17  ;;  %648 = vmatpush1.msra.mxu0 %v585_v18  ;;  %v579_v30 = vld [vmem:[#allocation12 + $0x80] sm:$0xff]  ;;  %v578_v32 = vld [vmem:[#allocation12 + $0x78] sm:$0xff]  ;;  %v577_v34 = vld [vmem:[#allocation12 + $0x70] sm:$0xff] }
  0xbc   : > { %813 = vmatpush1.msra.mxu1 %v750_v19  ;;  %649 = vmatprep.subr.mxu0 %v584_v20  ;;  %v744_v31 = vld [vmem:[#allocation14 + $0x80] sm:$0xff]  ;;  %v743_v33 = vld [vmem:[#allocation14 + $0x78] sm:$0xff]  ;;  %v742_v35 = vld [vmem:[#allocation14 + $0x70] sm:$0xff] }
  0xbd   : > { %814 = vmatprep.subr.mxu1 %v749_v21  ;;  %650 = vmatpush1.msra.mxu0 %v583_v22  ;;  %v576_v36 = vld [vmem:[#allocation12 + $0x68] sm:$0xff]  ;;  %v575_v38 = vld [vmem:[#allocation12 + $0x60] sm:$0xff]  ;;  %v574_v40 = vld [vmem:[#allocation12 + $0x58] sm:$0xff] }
  0xbe   : > { %815 = vmatpush1.msra.mxu1 %v748_v23  ;;  %651 = vmatprep.subr.mxu0 %v582_v24  ;;  %v741_v37 = vld [vmem:[#allocation14 + $0x68] sm:$0xff]  ;;  %v740_v39 = vld [vmem:[#allocation14 + $0x60] sm:$0xff]  ;;  %v739_v41 = vld [vmem:[#allocation14 + $0x58] sm:$0xff] }
  0xbf   : > { %816 = vmatprep.subr.mxu1 %v747_v25  ;;  %652 = vmatpush1.msra.mxu0 %v581_v26  ;;  %v573_v42 = vld [vmem:[#allocation12 + $0x50] sm:$0xff]  ;;  %v572_v44 = vld [vmem:[#allocation12 + $0x48] sm:$0xff]  ;;  %v571_v46 = vld [vmem:[#allocation12 + $0x40] sm:$0xff] }
  0xc0   : > { %817 = vmatpush1.msra.mxu1 %v746_v27  ;;  %653 = vmatprep.subr.mxu0 %v580_v28  ;;  %v738_v43 = vld [vmem:[#allocation14 + $0x50] sm:$0xff]  ;;  %v737_v45 = vld [vmem:[#allocation14 + $0x48] sm:$0xff]  ;;  %v736_v47 = vld [vmem:[#allocation14 + $0x40] sm:$0xff] }
  0xc1   : > { %818 = vmatprep.subr.mxu1 %v745_v29  ;;  %654 = vmatpush1.msra.mxu0 %v579_v30  ;;  %v570_v48 = vld [vmem:[#allocation12 + $0x38] sm:$0xff]  ;;  %v569_v50 = vld [vmem:[#allocation12 + $0x30] sm:$0xff]  ;;  %v568_v52 = vld [vmem:[#allocation12 + $0x28] sm:$0xff] }
  0xc2   : > { %819 = vmatpush1.msra.mxu1 %v744_v31  ;;  %655 = vmatprep.subr.mxu0 %v578_v32  ;;  %v735_v49 = vld [vmem:[#allocation14 + $0x38] sm:$0xff]  ;;  %v734_v51 = vld [vmem:[#allocation14 + $0x30] sm:$0xff]  ;;  %v733_v53 = vld [vmem:[#allocation14 + $0x28] sm:$0xff] }
  0xc3   : > { %820 = vmatprep.subr.mxu1 %v743_v33  ;;  %656 = vmatpush1.msra.mxu0 %v577_v34  ;;  %v567_v54 = vld [vmem:[#allocation12 + $0x20] sm:$0xff]  ;;  %v566_v56 = vld [vmem:[#allocation12 + $0x18] sm:$0xff]  ;;  %v565_v58 = vld [vmem:[#allocation12 + $0x10] sm:$0xff] }
  0xc4   : > { %821 = vmatpush1.msra.mxu1 %v742_v35  ;;  %657 = vmatprep.subr.mxu0 %v576_v36  ;;  %v732_v55 = vld [vmem:[#allocation14 + $0x20] sm:$0xff]  ;;  %v731_v57 = vld [vmem:[#allocation14 + $0x18] sm:$0xff]  ;;  %v730_v59 = vld [vmem:[#allocation14 + $0x10] sm:$0xff] }
  0xc5   : > { %822 = vmatprep.subr.mxu1 %v741_v37  ;;  %658 = vmatpush1.msra.mxu0 %v575_v38  ;;  %v564_v60 = vld [vmem:[#allocation12 + $0x8] sm:$0xff]  ;;  %v563_v62 = vld [vmem:[#allocation12] sm:$0xff]  ;;  %v626_v0 = vld [vmem:[#allocation12 + $0x1f8] sm:$0xff] }
  0xc6   : > { %823 = vmatpush1.msra.mxu1 %v740_v39  ;;  %659 = vmatprep.subr.mxu0 %v574_v40  ;;  %v729_v61 = vld [vmem:[#allocation14 + $0x8] sm:$0xff]  ;;  %v728_v63 = vld [vmem:[#allocation14] sm:$0xff]  ;;  %v791_v1 = vld [vmem:[#allocation14 + $0x1f8] sm:$0xff] }
  0xc7   : > { %824 = vmatprep.subr.mxu1 %v739_v41  ;;  %660 = vmatpush1.msra.mxu0 %v573_v42  ;;  %v625_v2 = vld [vmem:[#allocation12 + $0x1f0] sm:$0xff]  ;;  %v624_v4 = vld [vmem:[#allocation12 + $0x1e8] sm:$0xff]  ;;  %v623_v6 = vld [vmem:[#allocation12 + $0x1e0] sm:$0xff] }
  0xc8   : > { %825 = vmatpush1.msra.mxu1 %v738_v43  ;;  %661 = vmatprep.subr.mxu0 %v572_v44  ;;  %v790_v3 = vld [vmem:[#allocation14 + $0x1f0] sm:$0xff]  ;;  %v789_v5 = vld [vmem:[#allocation14 + $0x1e8] sm:$0xff]  ;;  %v788_v7 = vld [vmem:[#allocation14 + $0x1e0] sm:$0xff] }
  0xc9   : > { %826 = vmatprep.subr.mxu1 %v737_v45  ;;  %662 = vmatpush1.msra.mxu0 %v571_v46  ;;  %v622_v8 = vld [vmem:[#allocation12 + $0x1d8] sm:$0xff]  ;;  %v621_v10 = vld [vmem:[#allocation12 + $0x1d0] sm:$0xff]  ;;  %v620_v12 = vld [vmem:[#allocation12 + $0x1c8] sm:$0xff] }
  0xca   : > { %827 = vmatpush1.msra.mxu1 %v736_v47  ;;  %663 = vmatprep.subr.mxu0 %v570_v48  ;;  %v787_v9 = vld [vmem:[#allocation14 + $0x1d8] sm:$0xff]  ;;  %v786_v11 = vld [vmem:[#allocation14 + $0x1d0] sm:$0xff]  ;;  %v785_v13 = vld [vmem:[#allocation14 + $0x1c8] sm:$0xff] }
  0xcb   : > { %828 = vmatprep.subr.mxu1 %v735_v49  ;;  %664 = vmatpush1.msra.mxu0 %v569_v50  ;;  %v619_v14 = vld [vmem:[#allocation12 + $0x1c0] sm:$0xff]  ;;  %v618_v16 = vld [vmem:[#allocation12 + $0x1b8] sm:$0xff]  ;;  %v617_v18 = vld [vmem:[#allocation12 + $0x1b0] sm:$0xff] }
  0xcc   : > { %829 = vmatpush1.msra.mxu1 %v734_v51  ;;  %665 = vmatprep.subr.mxu0 %v568_v52  ;;  %v784_v15 = vld [vmem:[#allocation14 + $0x1c0] sm:$0xff]  ;;  %v783_v17 = vld [vmem:[#allocation14 + $0x1b8] sm:$0xff]  ;;  %v782_v19 = vld [vmem:[#allocation14 + $0x1b0] sm:$0xff] }
  0xcd   : > { %830 = vmatprep.subr.mxu1 %v733_v53  ;;  %666 = vmatpush1.msra.mxu0 %v567_v54  ;;  %v616_v20 = vld [vmem:[#allocation12 + $0x1a8] sm:$0xff]  ;;  %v615_v22 = vld [vmem:[#allocation12 + $0x1a0] sm:$0xff]  ;;  %v614_v24 = vld [vmem:[#allocation12 + $0x198] sm:$0xff] }
  0xce   : > { %831 = vmatpush1.msra.mxu1 %v732_v55  ;;  %667 = vmatprep.subr.mxu0 %v566_v56  ;;  %v781_v21 = vld [vmem:[#allocation14 + $0x1a8] sm:$0xff]  ;;  %v780_v23 = vld [vmem:[#allocation14 + $0x1a0] sm:$0xff]  ;;  %v779_v25 = vld [vmem:[#allocation14 + $0x198] sm:$0xff] }
  0xcf   : > { %832 = vmatprep.subr.mxu1 %v731_v57  ;;  %668 = vmatpush1.msra.mxu0 %v565_v58  ;;  %v613_v26 = vld [vmem:[#allocation12 + $0x190] sm:$0xff]  ;;  %v612_v28 = vld [vmem:[#allocation12 + $0x188] sm:$0xff]  ;;  %v611_v30 = vld [vmem:[#allocation12 + $0x180] sm:$0xff] }
  0xd0   : > { %833 = vmatpush1.msra.mxu1 %v730_v59  ;;  %669 = vmatprep.subr.mxu0 %v564_v60  ;;  %v778_v27 = vld [vmem:[#allocation14 + $0x190] sm:$0xff]  ;;  %v777_v29 = vld [vmem:[#allocation14 + $0x188] sm:$0xff]  ;;  %v776_v31 = vld [vmem:[#allocation14 + $0x180] sm:$0xff] }
  0xd1   : > { %834 = vmatprep.subr.mxu1 %v729_v61  ;;  %670 = vmatpush1.msra.mxu0 %v563_v62  ;;  %v610_v32 = vld [vmem:[#allocation12 + $0x178] sm:$0xff]  ;;  %v609_v34 = vld [vmem:[#allocation12 + $0x170] sm:$0xff]  ;;  %v608_v36 = vld [vmem:[#allocation12 + $0x168] sm:$0xff] }
  0xd2   : > { %835 = vmatpush1.msra.mxu1 %v728_v63  ;;  %671 = vmatprep.subr.mxu0 %v626_v0  ;;  %v775_v33 = vld [vmem:[#allocation14 + $0x178] sm:$0xff]  ;;  %v774_v35 = vld [vmem:[#allocation14 + $0x170] sm:$0xff]  ;;  %v773_v37 = vld [vmem:[#allocation14 + $0x168] sm:$0xff] }
  0xd3   : > { %836 = vmatprep.subr.mxu1 %v791_v1  ;;  %672 = vmatpush2.msra.mxu0 %v625_v2  ;;  %v607_v38 = vld [vmem:[#allocation12 + $0x160] sm:$0xff]  ;;  %v606_v40 = vld [vmem:[#allocation12 + $0x158] sm:$0xff]  ;;  %v605_v42 = vld [vmem:[#allocation12 + $0x150] sm:$0xff] }
  0xd4   : > { %837 = vmatpush2.msra.mxu1 %v790_v3  ;;  %673 = vmatprep.subr.mxu0 %v624_v4  ;;  %v772_v39 = vld [vmem:[#allocation14 + $0x160] sm:$0xff]  ;;  %v771_v41 = vld [vmem:[#allocation14 + $0x158] sm:$0xff]  ;;  %v770_v43 = vld [vmem:[#allocation14 + $0x150] sm:$0xff] }
  0xd5   : > { %838 = vmatprep.subr.mxu1 %v789_v5  ;;  %674 = vmatpush2.msra.mxu0 %v623_v6  ;;  %v604_v44 = vld [vmem:[#allocation12 + $0x148] sm:$0xff]  ;;  %v603_v46 = vld [vmem:[#allocation12 + $0x140] sm:$0xff]  ;;  %v602_v48 = vld [vmem:[#allocation12 + $0x138] sm:$0xff] }
  0xd6   : > { %839 = vmatpush2.msra.mxu1 %v788_v7  ;;  %675 = vmatprep.subr.mxu0 %v622_v8  ;;  %v769_v45 = vld [vmem:[#allocation14 + $0x148] sm:$0xff]  ;;  %v768_v47 = vld [vmem:[#allocation14 + $0x140] sm:$0xff]  ;;  %v767_v49 = vld [vmem:[#allocation14 + $0x138] sm:$0xff]  ;;  %v629_v8 = vlaneseq }
  0xd7   : > { %840 = vmatprep.subr.mxu1 %v787_v9  ;;  %676 = vmatpush2.msra.mxu0 %v621_v10  ;;  %v601_v50 = vld [vmem:[#allocation12 + $0x130] sm:$0xff]  ;;  %v600_v52 = vld [vmem:[#allocation12 + $0x128] sm:$0xff]  ;;  %v599_v54 = vld [vmem:[#allocation12 + $0x120] sm:$0xff] }
  0xd8   : > { %841 = vmatpush2.msra.mxu1 %v786_v11  ;;  %677 = vmatprep.subr.mxu0 %v620_v12  ;;  %v766_v51 = vld [vmem:[#allocation14 + $0x130] sm:$0xff]  ;;  %v765_v53 = vld [vmem:[#allocation14 + $0x128] sm:$0xff]  ;;  %v764_v55 = vld [vmem:[#allocation14 + $0x120] sm:$0xff]  ;;  %v630_v9 = vshrl.u32 %v629_v8, 7 }
  0xd9   : > { %842 = vmatprep.subr.mxu1 %v785_v13  ;;  %678 = vmatpush2.msra.mxu0 %v619_v14  ;;  %v598_v56 = vld [vmem:[#allocation12 + $0x118] sm:$0xff]  ;;  %v597_v58 = vld [vmem:[#allocation12 + $0x110] sm:$0xff]  ;;  %v596_v60 = vld [vmem:[#allocation12 + $0x108] sm:$0xff] }
  0xda   : > { %843 = vmatpush2.msra.mxu1 %v784_v15  ;;  %679 = vmatprep.subr.mxu0 %v618_v16  ;;  %v763_v57 = vld [vmem:[#allocation14 + $0x118] sm:$0xff]  ;;  %v762_v59 = vld [vmem:[#allocation14 + $0x110] sm:$0xff]  ;;  %v761_v61 = vld [vmem:[#allocation14 + $0x108] sm:$0xff]  ;;  %v631_v10 = vsub.s32 0, %v630_v9  ;;  %v635_v13 = vsub.s32 1, %v630_v9 }
  0xdb   : > { %844 = vmatprep.subr.mxu1 %v783_v17  ;;  %680 = vmatpush2.msra.mxu0 %v617_v18  ;;  %v595_v62 = vld [vmem:[#allocation12 + $0x100] sm:$0xff]  ;;  %v556_v63 = vld [vmem:[%s2742_s21 + $0x8] sm:$0xff]  ;;  %v558_v2 = vld [vmem:[%s2742_s21 + $0x18] sm:$0xff] }
  0xdc   : > { %845 = vmatpush2.msra.mxu1 %v782_v19  ;;  %681 = vmatprep.subr.mxu0 %v616_v20  ;;  %v760_v0 = vld [vmem:[#allocation14 + $0x100] sm:$0xff]  ;;  %v557_v3 = vld [vmem:[%s2742_s21 + $0x10] sm:$0xff]  ;;  %v560_v4 = vld [vmem:[%s2742_s21 + $0x28] sm:$0xff] }
  0xdd   : > { %846 = vmatprep.subr.mxu1 %v781_v21  ;;  %682 = vmatpush2.msra.mxu0 %v615_v22  ;;  %v555_v1 = vld [vmem:[%s2742_s21] sm:$0xff]  ;;  %v562_v6 = vld [vmem:[%s2742_s21 + $0x38] sm:$0xff]  ;;  %v561_v7 = vld [vmem:[%s2742_s21 + $0x30] sm:$0xff] }
  0xde   : > { %847 = vmatpush2.msra.mxu1 %v780_v23  ;;  %683 = vmatprep.subr.mxu0 %v614_v24  ;;  %v559_v5 = vld [vmem:[%s2742_s21 + $0x20] sm:$0xff] }
  0xdf   : > { %848 = vmatprep.subr.mxu1 %v779_v25  ;;  %684 = vmatpush2.msra.mxu0 %v613_v26  ;;  %v627_v11 = vld [vmem:[%s3003_s28] sm:$0x3] }
  0xe0   : > { %849 = vmatpush2.msra.mxu1 %v778_v27  ;;  %685 = vmatprep.subr.mxu0 %v612_v28  ;;  %v792_v12 = vld [vmem:[%s3004_s5] sm:$0x3]  ;;  %v632_v14 = vrot.slane %v627_v11, %v631_v10  ;;  %v636_v16 = vrot.slane %v627_v11, %v635_v13 }
  0xe1   : > { %850 = vmatprep.subr.mxu1 %v777_v29  ;;  %686 = vmatpush2.msra.mxu0 %v611_v30  ;;  %v797_v15 = vrot.slane %v792_v12, %v631_v10  ;;  %v801_v17 = vrot.slane %v792_v12, %v635_v13 }
  0xe2   : > { %851 = vmatpush2.msra.mxu1 %v776_v31  ;;  %687 = vmatprep.subr.mxu0 %v610_v32 }
  0xe3   : > { %852 = vmatprep.subr.mxu1 %v775_v33  ;;  %688 = vmatpush2.msra.mxu0 %v609_v34 }
  0xe4   : > { %853 = vmatpush2.msra.mxu1 %v774_v35  ;;  %689 = vmatprep.subr.mxu0 %v608_v36 }
  0xe5   : > { %854 = vmatprep.subr.mxu1 %v773_v37  ;;  %690 = vmatpush2.msra.mxu0 %v607_v38 }
  0xe6   : > { %855 = vmatpush2.msra.mxu1 %v772_v39  ;;  %691 = vmatprep.subr.mxu0 %v606_v40 }
  0xe7   : > { %856 = vmatprep.subr.mxu1 %v771_v41  ;;  %692 = vmatpush2.msra.mxu0 %v605_v42 }
  0xe8   : > { %857 = vmatpush2.msra.mxu1 %v770_v43  ;;  %693 = vmatprep.subr.mxu0 %v604_v44 }
  0xe9   : > { %858 = vmatprep.subr.mxu1 %v769_v45  ;;  %694 = vmatpush2.msra.mxu0 %v603_v46 }
  0xea   : > { %859 = vmatpush2.msra.mxu1 %v768_v47  ;;  %695 = vmatprep.subr.mxu0 %v602_v48 }
  0xeb   : > { %860 = vmatprep.subr.mxu1 %v767_v49  ;;  %696 = vmatpush2.msra.mxu0 %v601_v50 }
  0xec   : > { %861 = vmatpush2.msra.mxu1 %v766_v51  ;;  %697 = vmatprep.subr.mxu0 %v600_v52 }
  0xed   : > { %862 = vmatprep.subr.mxu1 %v765_v53  ;;  %698 = vmatpush2.msra.mxu0 %v599_v54 }
  0xee   : > { %863 = vmatpush2.msra.mxu1 %v764_v55  ;;  %699 = vmatprep.subr.mxu0 %v598_v56 }
  0xef   : > { %864 = vmatprep.subr.mxu1 %v763_v57  ;;  %700 = vmatpush2.msra.mxu0 %v597_v58 }
  0xf0   : > { %865 = vmatpush2.msra.mxu1 %v762_v59  ;;  %701 = vmatprep.subr.mxu0 %v596_v60 }
  0xf1   : > { %866 = vmatprep.subr.mxu1 %v761_v61  ;;  %702 = vmatpush2.msra.mxu0 %v595_v62 }
  0xf2   : > { %703 = vmatprep.mubr.f32.mxu0 %v556_v63  ;;  %867 = vmatpush2.msra.mxu1 %v760_v0 }
  0xf3   : > { %868 = vmatprep.mubr.f32.mxu1 %v556_v63  ;;  %704 = vmatmul.mubr.f32.vlgmr.msra.gmra.mxu0 %v555_v1 }
  0xf4   : > { %869 = vmatmul.mubr.f32.vlgmr.msra.gmra.mxu1 %v555_v1  ;;  %709 = vmatprep.mubr.f32.mxu0 %v558_v2 }
  0xf5   : > { %874 = vmatprep.mubr.f32.mxu1 %v558_v2 }
  0xf7   : > { %710 = vmatmul.mubr.f32.gmra.mxu0 %v557_v3 }
  0xf8   : > { %875 = vmatmul.mubr.f32.gmra.mxu1 %v557_v3  ;;  %715 = vmatprep.mubr.f32.mxu0 %v560_v4 }
  0xf9   : > { %880 = vmatprep.mubr.f32.mxu1 %v560_v4 }
  0xfb   : > { %716 = vmatmul.mubr.f32.gmra.mxu0 %v559_v5 }
  0xfc   : > { %881 = vmatmul.mubr.f32.gmra.mxu1 %v559_v5  ;;  %721 = vmatprep.mubr.f32.mxu0 %v562_v6 }
  0xfd   : > { %886 = vmatprep.mubr.f32.mxu1 %v562_v6 }
  0xff   : > { %722 = vmatmul.mubr.f32.gmra.mxu0 %v561_v7 }
 0x100   : > { %887 = vmatmul.mubr.f32.gmra.mxu1 %v561_v7 }
 0x1b3   : > { %v705_v18 = vpop.f32.mrf.mxu0 }
 0x1b4   : > { %v870_v19 = vpop.f32.mrf.mxu1  ;;  %v706_v20 = vadd.f32 %v705_v18, %v632_v14 }
 0x1b5   : > { %v871_v21 = vadd.f32 %v870_v19, %v797_v15  ;;  %v707_v22 = vpop.f32.mrf.mxu0 }
 0x1b6   : > { %v872_v23 = vpop.f32.mrf.mxu1  ;;  %893 = vst [vmem:[#allocation2 + $0x30] sm:$0xff] %v706_v20  ;;  %v708_v24 = vadd.f32 %v707_v22, %v636_v16 }
 0x1b7   : > { %897 = vst [vmem:[#allocation3] sm:$0xff] %v871_v21  ;;  %v873_v25 = vadd.f32 %v872_v23, %v801_v17  ;;  %v711_v26 = vpop.f32.mrf.mxu0 }
 0x1b8   : > { %v876_v27 = vpop.f32.mrf.mxu1  ;;  %902 = vst [vmem:[#allocation2 + $0x8] sm:$0xff] %v708_v24  ;;  %v712_v28 = vadd.f32 %v711_v26, %v632_v14 }
 0x1b9   : > { %907 = vst [vmem:[#allocation3 + $0x28] sm:$0xff] %v873_v25  ;;  %v877_v29 = vadd.f32 %v876_v27, %v797_v15  ;;  %v713_v30 = vpop.f32.mrf.mxu0 }
 0x1ba   : > { %v878_v31 = vpop.f32.mrf.mxu1  ;;  %894 = vst [vmem:[#allocation2] sm:$0xff] %v712_v28  ;;  %v714_v32 = vadd.f32 %v713_v30, %v636_v16 }
 0x1bb   : > { %898 = vst [vmem:[#allocation3 + $0x18] sm:$0xff] %v877_v29  ;;  %v879_v33 = vadd.f32 %v878_v31, %v801_v17  ;;  %v717_v34 = vpop.f32.mrf.mxu0 }
 0x1bc   : > { %v882_v35 = vpop.f32.mrf.mxu1  ;;  %903 = vst [vmem:[#allocation2 + $0x20] sm:$0xff] %v714_v32  ;;  %v718_v36 = vadd.f32 %v717_v34, %v632_v14 }
 0x1bd   : > { %908 = vst [vmem:[#allocation3 + $0x8] sm:$0xff] %v879_v33  ;;  %v883_v37 = vadd.f32 %v882_v35, %v797_v15  ;;  %v719_v38 = vpop.f32.mrf.mxu0 }
 0x1be   : > { %v884_v39 = vpop.f32.mrf.mxu1  ;;  %895 = vst [vmem:[#allocation2 + $0x18] sm:$0xff] %v718_v36  ;;  %v720_v40 = vadd.f32 %v719_v38, %v636_v16 }
 0x1bf   : > { %899 = vst [vmem:[#allocation3 + $0x10] sm:$0xff] %v883_v37  ;;  %v885_v41 = vadd.f32 %v884_v39, %v801_v17  ;;  %v723_v42 = vpop.f32.mrf.mxu0 }
 0x1c0   : > { %v888_v43 = vpop.f32.mrf.mxu1  ;;  %904 = vst [vmem:[#allocation2 + $0x28] sm:$0xff] %v720_v40  ;;  %v724_v44 = vadd.f32 %v723_v42, %v632_v14 }
 0x1c1   : > { %909 = vst [vmem:[#allocation3 + $0x30] sm:$0xff] %v885_v41  ;;  %v889_v45 = vadd.f32 %v888_v43, %v797_v15  ;;  %v725_v46 = vpop.f32.mrf.mxu0 }
 0x1c2   : > { %v890_v47 = vpop.f32.mrf.mxu1  ;;  %896 = vst [vmem:[#allocation2 + $0x10] sm:$0xff] %v724_v44  ;;  %v726_v48 = vadd.f32 %v725_v46, %v636_v16 }
 0x1c3   : > { %900 = vst [vmem:[#allocation3 + $0x20] sm:$0xff] %v889_v45  ;;  %v891_v49 = vadd.f32 %v890_v47, %v801_v17 }
 0x1c4   : > { %905 = vst [vmem:[#allocation2 + $0x38] sm:$0xff] %v726_v48 }
 0x1c5   : > { %910 = vst [vmem:[#allocation3 + $0x38] sm:$0xff] %v891_v49 }
 0x1c6 PF: > { %v946_v50 = vld [vmem:[#allocation11 + $0xf8] sm:$0xff]  ;;  %v945_v51 = vld [vmem:[#allocation11 + $0xf0] sm:$0xff]  ;;  %v944_v52 = vld [vmem:[#allocation11 + $0xe8] sm:$0xff]  ;;  %s3005_s7 = sld [smem:[#allocation39_spill]]  ;;  %vm1239_vm0 = vcmask 261120   ;;  %s1713_s27 = sshll.u32 %s2770_s6, 4  ;;  %s2853_s27 = int_to_ptr.vmem [resolvable:$true] %s1713_s27 }
 0x1c7   : > { %991 = vmatprep.subr.mxu0 %v946_v50  ;;  %v943_v53 = vld [vmem:[#allocation11 + $0xe0] sm:$0xff]  ;;  %v942_v54 = vld [vmem:[#allocation11 + $0xd8] sm:$0xff]  ;;  %v941_v55 = vld [vmem:[#allocation11 + $0xd0] sm:$0xff]  ;;  %s3006_s21 = sld [smem:[#allocation42_spill]] }
 0x1c8   : > { %992 = vmatpush1.msra.mxu0 %v945_v51  ;;  %v940_v56 = vld [vmem:[#allocation11 + $0xc8] sm:$0xff]  ;;  %v939_v57 = vld [vmem:[#allocation11 + $0xc0] sm:$0xff]  ;;  %v938_v58 = vld [vmem:[#allocation11 + $0xb8] sm:$0xff]  ;;  %s3007_s11 = sld [smem:[#allocation26_spill]] }
 0x1c9   : > { %993 = vmatprep.subr.mxu0 %v944_v52  ;;  %v937_v59 = vld [vmem:[#allocation11 + $0xb0] sm:$0xff]  ;;  %v936_v60 = vld [vmem:[#allocation11 + $0xa8] sm:$0xff]  ;;  %v935_v61 = vld [vmem:[#allocation11 + $0xa0] sm:$0xff]  ;;  %s3008_s10 = sld [smem:[#allocation27_spill]] }
 0x1ca   : > { %994 = vmatpush1.msra.mxu0 %v943_v53  ;;  %v934_v62 = vld [vmem:[#allocation11 + $0x98] sm:$0xff]  ;;  %v933_v63 = vld [vmem:[#allocation11 + $0x90] sm:$0xff]  ;;  %v932_v0 = vld [vmem:[#allocation11 + $0x88] sm:$0xff]  ;;  %s3009_s18 = sld [smem:[#allocation43_spill]] }
 0x1cb   : > { %995 = vmatprep.subr.mxu0 %v942_v54  ;;  %v931_v1 = vld [vmem:[#allocation11 + $0x80] sm:$0xff]  ;;  %v930_v2 = vld [vmem:[#allocation11 + $0x78] sm:$0xff]  ;;  %v929_v3 = vld [vmem:[#allocation11 + $0x70] sm:$0xff]  ;;  %s3010_s15 = sld [smem:[#allocation44_spill]] }
 0x1cc   : > { %996 = vmatpush1.msra.mxu0 %v941_v55  ;;  %v928_v4 = vld [vmem:[#allocation11 + $0x68] sm:$0xff]  ;;  %v927_v5 = vld [vmem:[#allocation11 + $0x60] sm:$0xff]  ;;  %v926_v6 = vld [vmem:[#allocation11 + $0x58] sm:$0xff]  ;;  %s3012_s4 = sld [smem:[#allocation32_spill]] }
 0x1cd   : > { %997 = vmatprep.subr.mxu0 %v940_v56  ;;  %v925_v7 = vld [vmem:[#allocation11 + $0x50] sm:$0xff]  ;;  %v924_v8 = vld [vmem:[#allocation11 + $0x48] sm:$0xff]  ;;  %v923_v9 = vld [vmem:[#allocation11 + $0x40] sm:$0xff]  ;;  %s3013_s2 = sld [smem:[#allocation45_spill]] }
 0x1ce   : > { %998 = vmatpush1.msra.mxu0 %v939_v57  ;;  %v2788_v10 = vld [vmem:[%s2752_s12 + $0x8] sm:$0xff]  ;;  %v922_v11 = vld [vmem:[#allocation11 + $0x38] sm:$0xff]  ;;  %v921_v12 = vld [vmem:[#allocation11 + $0x30] sm:$0xff]  ;;  %s1902_s20 = sshll.u32 %s3007_s11, 2  ;;  %s2303_s11 = scalar_lea.vmem %s2853_s27, 512 }
 0x1cf   : > { %999 = vmatprep.subr.mxu0 %v938_v58  ;;  %1055 = vmatprep.mubr.f32.mxu0 %v2788_v10  ;;  %v1084_v13 = vld [vmem:[#allocation2 + $0x38] sm:$0xff]  ;;  %v1083_v14 = vld [vmem:[#allocation2 + $0x28] sm:$0xff]  ;;  %v919_v16 = vld [vmem:[#allocation11 + $0x20] sm:$0xff]  ;;  %s1896_s17 = sshll.u32 %s3008_s10, 3  ;;  %p2304_p0 = scmp.ne.s32.totalorder %s2853_s27, %s2303_s11 }
 0x1d0   : > { %1000 = vmatpush1.msra.mxu0 %v937_v59  ;;  %v920_v15 = vld [vmem:[#allocation11 + $0x28] sm:$0xff]  ;;  %1938 = vmatprep.subr.mxu1 %v1084_v13  ;;  %v918_v17 = vld [vmem:[#allocation11 + $0x18] sm:$0xff]  ;;  %v917_v18 = vld [vmem:[#allocation11 + $0x10] sm:$0xff]  ;;  %s1710_s28 = sadd.s32 %s1902_s20, %s1896_s17  ;;  %s2449_s10 = smov [#allocation17]  }
 0x1d1   : > { %1001 = vmatprep.subr.mxu0 %v936_v60  ;;  %1939 = vmatpush3.xpose.msra.mxu1 %v1084_v13  ;;  %v916_v19 = vld [vmem:[#allocation11 + $0x8] sm:$0xff]  ;;  %v915_v20 = vld [vmem:[#allocation11] sm:$0xff]  ;;  %v978_v21 = vld [vmem:[#allocation11 + $0x1f8] sm:$0xff]  ;;  %s1897_s5 = sshll.u32 %s1710_s28, 7  ;;  %s2307_s24 = sshll.u32 %s2449_s10, 4  ;;  %s2308_s24 = int_to_ptr.vmem [resolvable:$false] %s2307_s24 }
 0x1d2   : > { %1002 = vmatpush1.msra.mxu0 %v935_v61  ;;  %1940 = vmatprep.subr.mxu1 %v1083_v14  ;;  %v977_v22 = vld [vmem:[#allocation11 + $0x1f0] sm:$0xff]  ;;  %v976_v23 = vld [vmem:[#allocation11 + $0x1e8] sm:$0xff]  ;;  %v975_v24 = vld [vmem:[#allocation11 + $0x1e0] sm:$0xff]  ;;  %p3014_p10 = scmp.ne.s32.totalorder %s3012_s4, 0  ;;  %s2309_s14 = scalar_lea.vmem %s2308_s24, 1024 }
 0x1d3   : > { %1003 = vmatprep.subr.mxu0 %v934_v62  ;;  %v974_v25 = vld [vmem:[#allocation11 + $0x1d8] sm:$0xff]  ;;  %v973_v26 = vld [vmem:[#allocation11 + $0x1d0] sm:$0xff]  ;;  %v972_v27 = vld [vmem:[#allocation11 + $0x1c8] sm:$0xff]  ;;  %v981_v62 = vlaneseq  ;;  %s2851_s3 = scalar_lea.hbm %s3013_s2, %s1897_s5  ;;  %p2310_p1 = scmp.lt.s32.totalorder %s2853_s27, %s2308_s24 }
 0x1d4   : > { %1004 = vmatpush1.msra.mxu0 %v933_v63  ;;  %v971_v28 = vld [vmem:[#allocation11 + $0x1c0] sm:$0xff]  ;;  %v970_v29 = vld [vmem:[#allocation11 + $0x1b8] sm:$0xff]  ;;  %v969_v30 = vld [vmem:[#allocation11 + $0x1b0] sm:$0xff]  ;;  %p2305_p4 = pnand %p2304_p0, %p3014_p10  ;;  %p2311_p6 = scmp.lt.s32.totalorder %s2309_s14, %s2303_s11 }
 0x1d5   : > { %1005 = vmatprep.subr.mxu0 %v932_v0  ;;  %1941 = vmatpush3.xpose.msra.mxu1 %v1083_v14  ;;  %v968_v31 = vld [vmem:[#allocation11 + $0x1a8] sm:$0xff]  ;;  %v967_v32 = vld [vmem:[#allocation11 + $0x1a0] sm:$0xff]  ;;  %v966_v33 = vld [vmem:[#allocation11 + $0x198] sm:$0xff]  ;;  %v982_v63 = vshrl.u32 %v981_v62, 7 }
 0x1d6   : > { %1006 = vmatpush1.msra.mxu0 %v931_v1  ;;  %v965_v34 = vld [vmem:[#allocation11 + $0x190] sm:$0xff]  ;;  %v964_v35 = vld [vmem:[#allocation11 + $0x188] sm:$0xff]  ;;  %v963_v36 = vld [vmem:[#allocation11 + $0x180] sm:$0xff]  ;;  %p2306_p9 = pneg %p2305_p4  ;;  %p2312_p11 = por %p2311_p6, %p2310_p1 }
 0x1d7   : > { %1007 = vmatprep.subr.mxu0 %v930_v2  ;;  %v962_v37 = vld [vmem:[#allocation11 + $0x178] sm:$0xff]  ;;  %v961_v38 = vld [vmem:[#allocation11 + $0x170] sm:$0xff]  ;;  %v960_v39 = vld [vmem:[#allocation11 + $0x168] sm:$0xff]  ;;  %v2803_v0 = vsub.s32 0, %v982_v63  ;;  %v2808_v2 = vsub.s32 1, %v982_v63 }
 0x1d8   : > { %1008 = vmatpush1.msra.mxu0 %v929_v3  ;;  %v959_v40 = vld [vmem:[#allocation11 + $0x160] sm:$0xff]  ;;  %v958_v41 = vld [vmem:[#allocation11 + $0x158] sm:$0xff]  ;;  %v957_v42 = vld [vmem:[#allocation11 + $0x150] sm:$0xff]  ;;  %p2313_p5 = pnand %p2312_p11, %p2306_p9 }
 0x1d9   : > { %1009 = vmatprep.subr.mxu0 %v928_v4  ;;  %v956_v43 = vld [vmem:[#allocation11 + $0x148] sm:$0xff]  ;;  %v955_v44 = vld [vmem:[#allocation11 + $0x140] sm:$0xff]  ;;  %v954_v45 = vld [vmem:[#allocation11 + $0x138] sm:$0xff] }
 0x1da   : > { %1010 = vmatpush1.msra.mxu0 %v927_v5  ;;  %v953_v46 = vld [vmem:[#allocation11 + $0x130] sm:$0xff]  ;;  %v952_v47 = vld [vmem:[#allocation11 + $0x128] sm:$0xff]  ;;  %v951_v48 = vld [vmem:[#allocation11 + $0x120] sm:$0xff] }
 0x1db   : > { %1011 = vmatprep.subr.mxu0 %v926_v6  ;;  %v950_v49 = vld [vmem:[#allocation11 + $0x118] sm:$0xff]  ;;  %v949_v50 = vld [vmem:[#allocation11 + $0x110] sm:$0xff]  ;;  %v948_v51 = vld [vmem:[#allocation11 + $0x108] sm:$0xff] }
 0x1dc   : > { %1012 = vmatpush1.msra.mxu0 %v925_v7  ;;  %v947_v52 = vld [vmem:[#allocation11 + $0x100] sm:$0xff]  ;;  %v1080_v54 = vld [vmem:[#allocation2 + $0x10] sm:$0xff]  ;;  %v2795_v55 = vld [vmem:[%s2752_s12 + $0x18] sm:$0xff] }
 0x1dd   : > { %1013 = vmatprep.subr.mxu0 %v924_v8  ;;  %v2792_v53 = vld [vmem:[%s2752_s12] sm:$0xff]  ;;  %v1079_v56 = vld [vmem:[#allocation2 + $0x18] sm:$0xff]  ;;  %v2800_v57 = vld [vmem:[%s2752_s12 + $0x10] sm:$0xff] }
 0x1de   : > { %1014 = vmatpush1.msra.mxu0 %v923_v9  ;;  %v1078_v58 = vld [vmem:[#allocation2] sm:$0xff]  ;;  %v1077_v60 = vld [vmem:[#allocation2 + $0x30] sm:$0xff]  ;;  %v1081_v61 = vld [vmem:[#allocation2 + $0x8] sm:$0xff] }
 0x1df   : > { %1015 = vmatprep.subr.mxu0 %v922_v11  ;;  %v1082_v59 = vld [vmem:[#allocation2 + $0x20] sm:$0xff] }
 0x1e0   : > { %1016 = vmatpush1.msra.mxu0 %v921_v12  ;;  %1942 = vmatprep.subr.mxu1 %v1082_v59  ;;  %v979_v1 = vld [vmem:[%s3005_s7] sm:$0x3] }
 0x1e1   : > { %1017 = vmatprep.subr.mxu0 %v920_v15  ;;  %1943 = vmatpush3.xpose.msra.mxu1 %v1082_v59  ;;  %v984_v3 = vrot.slane %v979_v1, %v2803_v0  ;;  %v988_v4 = vrot.slane %v979_v1, %v2808_v2 }
 0x1e2   : > { %1018 = vmatpush1.msra.mxu0 %v919_v16  ;;  %1944 = vmatprep.subr.mxu1 %v1081_v61 }
 0x1e3   : > { %1019 = vmatprep.subr.mxu0 %v918_v17 }
 0x1e4   : > { %1020 = vmatpush1.msra.mxu0 %v917_v18 }
 0x1e5   : > { %1021 = vmatprep.subr.mxu0 %v916_v19  ;;  %1945 = vmatpush3.xpose.msra.mxu1 %v1081_v61 }
 0x1e6   : > { %1022 = vmatpush1.msra.mxu0 %v915_v20 }
 0x1e7   : > { %1023 = vmatprep.subr.mxu0 %v978_v21 }
 0x1e8   : > { %1024 = vmatpush2.msra.mxu0 %v977_v22 }
 0x1e9   : > { %1025 = vmatprep.subr.mxu0 %v976_v23 }
 0x1ea   : > { %1026 = vmatpush2.msra.mxu0 %v975_v24 }
 0x1eb   : > { %1027 = vmatprep.subr.mxu0 %v974_v25 }
 0x1ec   : > { %1028 = vmatpush2.msra.mxu0 %v973_v26 }
 0x1ed   : > { %1029 = vmatprep.subr.mxu0 %v972_v27 }
 0x1ee   : > { %1030 = vmatpush2.msra.mxu0 %v971_v28 }
 0x1ef   : > { %1031 = vmatprep.subr.mxu0 %v970_v29 }
 0x1f0   : > { %1032 = vmatpush2.msra.mxu0 %v969_v30 }
 0x1f1   : > { %1033 = vmatprep.subr.mxu0 %v968_v31 }
 0x1f2   : > { %1034 = vmatpush2.msra.mxu0 %v967_v32 }
 0x1f3   : > { %1035 = vmatprep.subr.mxu0 %v966_v33 }
 0x1f4   : > { %1036 = vmatpush2.msra.mxu0 %v965_v34 }
 0x1f5   : > { %1037 = vmatprep.subr.mxu0 %v964_v35 }
 0x1f6   : > { %1038 = vmatpush2.msra.mxu0 %v963_v36 }
 0x1f7   : > { %1039 = vmatprep.subr.mxu0 %v962_v37 }
 0x1f8   : > { %1040 = vmatpush2.msra.mxu0 %v961_v38 }
 0x1f9   : > { %1041 = vmatprep.subr.mxu0 %v960_v39 }
 0x1fa   : > { %1042 = vmatpush2.msra.mxu0 %v959_v40 }
 0x1fb   : > { %1043 = vmatprep.subr.mxu0 %v958_v41 }
 0x1fc   : > { %1044 = vmatpush2.msra.mxu0 %v957_v42 }
 0x1fd   : > { %1045 = vmatprep.subr.mxu0 %v956_v43 }
 0x1fe   : > { %1046 = vmatpush2.msra.mxu0 %v955_v44 }
 0x1ff   : > { %1047 = vmatprep.subr.mxu0 %v954_v45 }
 0x200   : > { %1048 = vmatpush2.msra.mxu0 %v953_v46  ;;  %v1291_v46 = vld [vmem:[#allocation3 + $0x38] sm:$0xff] }
 0x201   : > { %1049 = vmatprep.subr.mxu0 %v952_v47  ;;  %v1290_v47 = vld [vmem:[#allocation3 + $0x30] sm:$0xff]  ;;  %1960 = vmatprep.subr.mxu1 %v1291_v46 }
 0x202   : > { %1050 = vmatpush2.msra.mxu0 %v951_v48  ;;  %v1287_v48 = vld [vmem:[#allocation3 + $0x20] sm:$0xff] }
 0x203   : > { %1051 = vmatprep.subr.mxu0 %v950_v49  ;;  %v1289_v49 = vld [vmem:[#allocation3 + $0x8] sm:$0xff] }
 0x204   : > { %1052 = vmatpush2.msra.mxu0 %v949_v50  ;;  %v1286_v50 = vld [vmem:[#allocation3 + $0x10] sm:$0xff] }
 0x205   : > { %1053 = vmatprep.subr.mxu0 %v948_v51  ;;  %v1288_v51 = vld [vmem:[#allocation3 + $0x28] sm:$0xff] }
 0x206   : > { %1054 = vmatpush2.msra.mxu0 %v947_v52  ;;  %v1285_v52 = vld [vmem:[#allocation3 + $0x18] sm:$0xff] }
 0x207   : > { %1056 = vmatmul.mubr.f32.vlgmr.msra.gmra.mxu0 %v2792_v53  ;;  %1927 = vmatprep.subr.mxu0 %v1080_v54 }
 0x208   : > { %1061 = vmatprep.mubr.f32.mxu0 %v2795_v55  ;;  %1928 = vmatpush3.xpose.msra.mxu0 %v1080_v54  ;;  %v1284_v54 = vld [vmem:[#allocation3] sm:$0xff] }
 0x209   : > { %1929 = vmatprep.subr.mxu0 %v1079_v56 }
 0x20b   : > { %1062 = vmatmul.mubr.f32.gmra.mxu0 %v2800_v57 }
 0x20c   : > { %1930 = vmatpush3.xpose.msra.mxu0 %v1079_v56  ;;  %v1501_v56 = vld [vmem:[#allocation15 + $0xf8] sm:$0xff] }
 0x20d   : > { %1931 = vmatprep.subr.mxu0 %v1078_v58 }
 0x210   : > { %1932 = vmatpush3.xpose.msra.mxu0 %v1078_v58 }
 0x211   : > { %1933 = vmatprep.subr.mxu0 %v1077_v60 }
 0x214   : > { %1934 = vmatpush3.xpose.msra.mxu0 %v1077_v60 }
 0x215   : > { %1949 = vmatprep.subr.mxu0 %v1287_v48 }
 0x2c7   : > { %v1057_v5 = vpop.f32.mrf.mxu0 }
 0x2c8   : > { %v1058_v6 = vadd.f32 %v1057_v5, %v984_v3 }
 0x2c9   : > { %v1059_v7 = vpop.f32.mrf.mxu0 }
 0x2ca   : > { %1935 = vmatprep.mubr.f32.mxu0 %v1058_v6  ;;  %v1060_v8 = vadd.f32 %v1059_v7, %v988_v4  ;;  %v1500_v6 = vld [vmem:[#allocation15 + $0xf0] sm:$0xff]  ;;  %v1499_v7 = vld [vmem:[#allocation15 + $0xe8] sm:$0xff] }
 0x2cb   : > { %v1063_v9 = vpop.f32.mrf.mxu0 }
 0x2cc   : > { %v1064_v11 = vadd.f32 %v1063_v9, %v984_v3  ;;  %1946 = vmatprep.mubr.f32.mxu1 %v1060_v8  ;;  %v1498_v9 = vld [vmem:[#allocation15 + $0xe0] sm:$0xff] }
 0x2cd   : > { %v1065_v12 = vpop.f32.mrf.mxu0 }
 0x2ce   : > { %v1066_v13 = vadd.f32 %v1065_v12, %v988_v4  ;;  %1936 = vmatmul.mubr.f32.vlgmr.msra.gmra.mxu0 %v1064_v11  ;;  %v1497_v12 = vld [vmem:[#allocation15 + $0xd8] sm:$0xff] }
 0x2cf   : > { %1950 = vmatpush3.msra.mxu0 %v1287_v48  ;;  %v1525_v48 = vld [vmem:[#allocation15 + $0x1b8] sm:$0xff] }
 0x2d0   : > { %1947 = vmatmul.mubr.f32.vlgmr.msra.gmra.mxu1 %v1066_v13  ;;  %1951 = vmatprep.subr.mxu0 %v1286_v50  ;;  %v1496_v13 = vld [vmem:[#allocation15 + $0xd0] sm:$0xff] }
 0x2d1   : > { %1961 = vmatpush3.msra.mxu1 %v1291_v46  ;;  %1952 = vmatpush3.msra.mxu0 %v1286_v50  ;;  %v1527_v46 = vld [vmem:[#allocation15 + $0x1c8] sm:$0xff] }
 0x2d2   : > { %1962 = vmatprep.subr.mxu1 %v1290_v47  ;;  %1953 = vmatprep.subr.mxu0 %v1285_v52  ;;  %v1523_v50 = vld [vmem:[#allocation15 + $0x1a8] sm:$0xff] }
 0x2d3   : > { %1963 = vmatpush3.msra.mxu1 %v1290_v47  ;;  %1954 = vmatpush3.msra.mxu0 %v1285_v52  ;;  %v1526_v47 = vld [vmem:[#allocation15 + $0x1c0] sm:$0xff]  ;;  %v1521_v52 = vld [vmem:[#allocation15 + $0x198] sm:$0xff] }
 0x2d4   : > { %1964 = vmatprep.subr.mxu1 %v1289_v49  ;;  %1955 = vmatprep.subr.mxu0 %v1284_v54 }
 0x2d5   : > { %1965 = vmatpush3.msra.mxu1 %v1289_v49  ;;  %1956 = vmatpush3.msra.mxu0 %v1284_v54  ;;  %v1524_v49 = vld [vmem:[#allocation15 + $0x1b0] sm:$0xff] }
 0x2d6   : > { %1966 = vmatprep.subr.mxu1 %v1288_v51  ;;  %v1520_v54 = vld [vmem:[#allocation15 + $0x190] sm:$0xff] }
 0x2d7   : > { %1967 = vmatpush3.msra.mxu1 %v1288_v51  ;;  %v1522_v51 = vld [vmem:[#allocation15 + $0x1a0] sm:$0xff] }
 0x2d8   : > { %1546 = vmatprep.subr.mxu1 %v1501_v56  ;;  %v1519_v56 = vld [vmem:[#allocation15 + $0x188] sm:$0xff] }
 0x38e   : > { %v1937_v14 = vpop.f32.mrf.mxu0 }
 0x38f   : > { %v1236_v19 = vmul.f32 0.088388346, %v1937_v14  ;;  %v1495_v14 = vld [vmem:[#allocation15 + $0xc8] sm:$0xff] }
 0x390   : > { %v1948_v15 = vpop.f32.mrf.mxu1  ;;  %v1151_v17 = vpop.f32.mrf.mxu0 }
 0x391   : > { %v1238_v16 = vmul.f32 0.088388346, %v1948_v15  ;;  %v1235_v22 = vmul.f32 0.088388346, %v1151_v17  ;;  %v1243_v24 = vsel %vm1239_vm0, %v1236_v19, -inf  ;;  %v1494_v15 = vld [vmem:[#allocation15 + $0xc0] sm:$0xff] }
 0x392   : > { %v1226_v18 = vpop.f32.mrf.mxu1  ;;  %v1492_v17 = vld [vmem:[#allocation15 + $0xb0] sm:$0xff] }
 0x393   : > { %v1237_v20 = vmul.f32 0.088388346, %v1226_v18  ;;  %v1249_v21 = vsel %vm1239_vm0, %v1238_v16, -inf  ;;  %v1240_v25 = vsel %vm1239_vm0, %v1235_v22, -inf  ;;  %v1491_v18 = vld [vmem:[#allocation15 + $0xa8] sm:$0xff] }
 0x394   : > { %1250 = vmax.xlane.f32.xlu1 %v1249_v21  ;;  %v1488_v21 = vld [vmem:[#allocation15 + $0x90] sm:$0xff] }
 0x395   : > { %v1246_v23 = vsel %vm1239_vm0, %v1237_v20, -inf }
 0x396   : > { %1247 = vmax.xlane.f32.xlu0 %v1246_v23  ;;  %v1486_v23 = vld [vmem:[#allocation15 + $0x80] sm:$0xff] }
 0x398   : > { %1244 = vmax.xlane.f32.xlu1 %v1243_v24  ;;  %v1485_v24 = vld [vmem:[#allocation15 + $0x78] sm:$0xff] }
 0x39a   : > { %1241 = vmax.xlane.f32.xlu0 %v1240_v25  ;;  %v1484_v25 = vld [vmem:[#allocation15 + $0x70] sm:$0xff] }
 0x41d   : > { %v1251_v26 = vpop.xlane.xlu1 %1250 }
 0x41e   : > { %v1255_v27 = vsub.f32 %v1238_v16, %v1251_v26  ;;  %v1493_v16 = vld [vmem:[#allocation15 + $0xb8] sm:$0xff]  ;;  %v1483_v26 = vld [vmem:[#allocation15 + $0x68] sm:$0xff] }
 0x41f   : > { %v1248_v28 = vpop.xlane.xlu0 %1247 }
 0x420   : > { %v1254_v29 = vsub.f32 %v1237_v20, %v1248_v28  ;;  %v1262_v31 = vmul.f32 1.442695, %v1255_v27  ;;  %v1489_v20 = vld [vmem:[#allocation15 + $0x98] sm:$0xff]  ;;  %v1482_v27 = vld [vmem:[#allocation15 + $0x60] sm:$0xff] }
 0x421   : > { %v1245_v30 = vpop.xlane.xlu1 %1244  ;;  %v1481_v28 = vld [vmem:[#allocation15 + $0x58] sm:$0xff] }
 0x422   : > { %v1260_v32 = vmul.f32 1.442695, %v1254_v29  ;;  %v1253_v33 = vsub.f32 %v1236_v19, %v1245_v30  ;;  %v1490_v19 = vld [vmem:[#allocation15 + $0xa0] sm:$0xff]  ;;  %v1480_v29 = vld [vmem:[#allocation15 + $0x50] sm:$0xff]  ;;  %v1479_v30 = vld [vmem:[#allocation15 + $0x48] sm:$0xff] }
 0x423   : > { %v1242_v34 = vpop.xlane.xlu0 %1241 }
 0x424   : > { %2123 = vpow2.f32 %v1260_v32  ;;  %v1252_v35 = vsub.f32 %v1235_v22, %v1242_v34  ;;  %v1258_v36 = vmul.f32 1.442695, %v1253_v33  ;;  %v1487_v22 = vld [vmem:[#allocation15 + $0x88] sm:$0xff]  ;;  %v1477_v32 = vld [vmem:[#allocation15 + $0x38] sm:$0xff]  ;;  %v1476_v33 = vld [vmem:[#allocation15 + $0x30] sm:$0xff] }
 0x425   : > { %2125 = vpow2.f32 %v1262_v31  ;;  %v1478_v31 = vld [vmem:[#allocation15 + $0x40] sm:$0xff]  ;;  %v1475_v34 = vld [vmem:[#allocation15 + $0x28] sm:$0xff] }
 0x426   : > { %v1256_v37 = vmul.f32 1.442695, %v1252_v35  ;;  %v1474_v35 = vld [vmem:[#allocation15 + $0x20] sm:$0xff] }
 0x428   : > { %2127 = vpow2.f32 %v1256_v37  ;;  %v1472_v37 = vld [vmem:[#allocation15 + $0x10] sm:$0xff] }
 0x429   : > { %2129 = vpow2.f32 %v1258_v36  ;;  %v1473_v36 = vld [vmem:[#allocation15 + $0x18] sm:$0xff] }
 0x431   : > { %v2124_v38 = vpop.eup %2123 }
 0x432   : > { %v1270_v39 = vsel %vm1239_vm0, %v2124_v38, 0.0  ;;  %v2126_v40 = vpop.eup %2125 }
 0x433   : > { %1271 = vadd.xlane.f32.xlu0 %v1270_v39  ;;  %v1273_v42 = vsel %vm1239_vm0, %v2126_v40, 0.0  ;;  %v1470_v39 = vld [vmem:[#allocation15] sm:$0xff] }
 0x435   : > { %v2128_v41 = vpop.eup %2127 }
 0x436   : > { %v1264_v43 = vsel %vm1239_vm0, %v2128_v41, 0.0  ;;  %v2130_v44 = vpop.eup %2129 }
 0x437   : > { %1274 = vadd.xlane.f32.xlu0 %v1273_v42  ;;  %1265 = vadd.xlane.f32.xlu1 %v1264_v43  ;;  %v1267_v45 = vsel %vm1239_vm0, %v2130_v44, 0.0  ;;  %v1531_v42 = vld [vmem:[#allocation15 + $0x1e8] sm:$0xff]  ;;  %v1530_v43 = vld [vmem:[#allocation15 + $0x1e0] sm:$0xff] }
 0x43b   : > { %1268 = vadd.xlane.f32.xlu1 %v1267_v45  ;;  %v1528_v45 = vld [vmem:[#allocation15 + $0x1d0] sm:$0xff] }
 0x4bc   : > { %v1272_v58 = vpop.xlane.xlu0 %1271 }
 0x4bd   : > { %2131 = vrcp.f32 %v1272_v58  ;;  %v1518_v58 = vld [vmem:[#allocation15 + $0x180] sm:$0xff] }
 0x4c0   : > { %v1266_v59 = vpop.xlane.xlu1 %1265  ;;  %v1275_v60 = vpop.xlane.xlu0 %1274 }
 0x4c1   : > { %2133 = vrcp.f32 %v1266_v59  ;;  %v1517_v59 = vld [vmem:[#allocation15 + $0x178] sm:$0xff] }
 0x4c2   : > { %2135 = vrcp.f32 %v1275_v60  ;;  %v1516_v60 = vld [vmem:[#allocation15 + $0x170] sm:$0xff] }
 0x4c4   : > { %v1269_v61 = vpop.xlane.xlu1 %1268 }
 0x4c5   : > { %2137 = vrcp.f32 %v1269_v61  ;;  %v1515_v61 = vld [vmem:[#allocation15 + $0x168] sm:$0xff] }
 0x4ca   : > { %v2132_v62 = vpop.eup %2131 }
 0x4cb   : > { %v1282_v63 = vmul.f32 %v2132_v62, %v2124_v38  ;;  %v1471_v38 = vld [vmem:[#allocation15 + $0x8] sm:$0xff]  ;;  %v1514_v62 = vld [vmem:[#allocation15 + $0x160] sm:$0xff] }
 0x4cd   : > { %1968 = vmatprep.mubr.msk.f32.mxu1 %vm1239_vm0, %v1282_v63  ;;  %v1513_v63 = vld [vmem:[#allocation15 + $0x158] sm:$0xff] }
 0x4ce   : > { %v2134_v1 = vpop.eup %2133 }
 0x4cf   : > { %v2136_v3 = vpop.eup %2135  ;;  %v1280_v4 = vmul.f32 %v2134_v1, %v2128_v41  ;;  %v1532_v41 = vld [vmem:[#allocation15 + $0x1f0] sm:$0xff] }
 0x4d0   : > { %v1283_v5 = vmul.f32 %v2136_v3, %v2126_v40  ;;  %v1533_v40 = vld [vmem:[#allocation15 + $0x1f8] sm:$0xff]  ;;  %v1512_v1 = vld [vmem:[#allocation15 + $0x150] sm:$0xff]  ;;  %v1511_v3 = vld [vmem:[#allocation15 + $0x148] sm:$0xff] }
 0x4d1   : > { %1957 = vmatprep.mubr.msk.f32.mxu0 %vm1239_vm0, %v1280_v4  ;;  %v1510_v4 = vld [vmem:[#allocation15 + $0x140] sm:$0xff] }
 0x4d2   : > { %v2138_v8 = vpop.eup %2137  ;;  %1969 = vmatmul.mubr.msk.f32.vlgmr.msra.gmra.mxu1 %vm1239_vm0, %v1283_v5  ;;  %v1509_v5 = vld [vmem:[#allocation15 + $0x138] sm:$0xff] }
 0x4d3   : > { %v1281_v11 = vmul.f32 %v2138_v8, %v2130_v44  ;;  %1547 = vmatpush1.msra.mxu1 %v1500_v6  ;;  %v1529_v44 = vld [vmem:[#allocation15 + $0x1d8] sm:$0xff]  ;;  %v1508_v6 = vld [vmem:[#allocation15 + $0x130] sm:$0xff]  ;;  %v1506_v8 = vld [vmem:[#allocation15 + $0x120] sm:$0xff] }
 0x4d4   : > { %1548 = vmatprep.subr.mxu1 %v1499_v7  ;;  %v1507_v7 = vld [vmem:[#allocation15 + $0x128] sm:$0xff] }
 0x4d5   : > { %1958 = vmatmul.mubr.msk.f32.vlgmr.msra.gmra.mxu0 %vm1239_vm0, %v1281_v11  ;;  %1549 = vmatpush1.msra.mxu1 %v1498_v9  ;;  %v1505_v9 = vld [vmem:[#allocation15 + $0x118] sm:$0xff]  ;;  %v1504_v11 = vld [vmem:[#allocation15 + $0x110] sm:$0xff] }
 0x4d6   : > { %1550 = vmatprep.subr.mxu1 %v1497_v12  ;;  %v1503_v12 = vld [vmem:[#allocation15 + $0x108] sm:$0xff] }
 0x4d7   : > { %1551 = vmatpush1.msra.mxu1 %v1496_v13  ;;  %v1502_v13 = vld [vmem:[#allocation15 + $0x100] sm:$0xff] }
 0x4d8   : > { %1552 = vmatprep.subr.mxu1 %v1495_v14 }
 0x4d9   : > { %1553 = vmatpush1.msra.mxu1 %v1494_v15 }
 0x4da   : > { %1554 = vmatprep.subr.mxu1 %v1493_v16 }
 0x4db   : > { %1555 = vmatpush1.msra.mxu1 %v1492_v17 }
 0x4dc   : > { %1556 = vmatprep.subr.mxu1 %v1491_v18  ;;  %v1534_v18 = vld [vmem:[%s3006_s21] sm:$0x3]  ;;  %s2859_s21 = scalar_lea.sflag [#allocation8], %s485_s16 }
 0x4dd   : > { %1557 = vmatpush1.msra.mxu1 %v1490_v19  ;;  %v1539_v19 = vrot.slane %v1534_v18, %v2803_v0 }
 0x4de   : > { %1558 = vmatprep.subr.mxu1 %v1489_v20  ;;  %v1543_v20 = vrot.slane %v1534_v18, %v2808_v2 }
 0x4df   : > { %1559 = vmatpush1.msra.mxu1 %v1488_v21 }
 0x4e0   : > { %1560 = vmatprep.subr.mxu1 %v1487_v22 }
 0x4e1   : > { %1561 = vmatpush1.msra.mxu1 %v1486_v23 }
 0x4e2   : > { %1562 = vmatprep.subr.mxu1 %v1485_v24 }
 0x4e3   : > { %1563 = vmatpush1.msra.mxu1 %v1484_v25 }
 0x4e4   : > { %1564 = vmatprep.subr.mxu1 %v1483_v26 }
 0x4e5   : > { %1565 = vmatpush1.msra.mxu1 %v1482_v27 }
 0x4e6   : > { %1566 = vmatprep.subr.mxu1 %v1481_v28 }
 0x4e7   : > { %1567 = vmatpush1.msra.mxu1 %v1480_v29 }
 0x4e8   : > { %1568 = vmatprep.subr.mxu1 %v1479_v30 }
 0x4e9   : > { %1569 = vmatpush1.msra.mxu1 %v1478_v31 }
 0x4ea   : > { %1570 = vmatprep.subr.mxu1 %v1477_v32 }
 0x4eb   : > { %1571 = vmatpush1.msra.mxu1 %v1476_v33 }
 0x4ec   : > { %1572 = vmatprep.subr.mxu1 %v1475_v34 }
 0x4ed   : > { %1573 = vmatpush1.msra.mxu1 %v1474_v35 }
 0x4ee   : > { %1574 = vmatprep.subr.mxu1 %v1473_v36 }
 0x4ef   : > { %1575 = vmatpush1.msra.mxu1 %v1472_v37 }
 0x4f0   : > { %1576 = vmatprep.subr.mxu1 %v1471_v38 }
 0x4f1   : > { %1577 = vmatpush1.msra.mxu1 %v1470_v39 }
 0x4f2   : > { %1578 = vmatprep.subr.mxu1 %v1533_v40 }
 0x4f3   : > { %1579 = vmatpush2.msra.mxu1 %v1532_v41 }
 0x4f4   : > { %1580 = vmatprep.subr.mxu1 %v1531_v42 }
 0x4f5   : > { %1581 = vmatpush2.msra.mxu1 %v1530_v43 }
 0x4f6   : > { %1582 = vmatprep.subr.mxu1 %v1529_v44 }
 0x4f7   : > { %1583 = vmatpush2.msra.mxu1 %v1528_v45 }
 0x4f8   : > { %1584 = vmatprep.subr.mxu1 %v1527_v46 }
 0x4f9   : > { %1585 = vmatpush2.msra.mxu1 %v1526_v47 }
 0x4fa   : > { %1586 = vmatprep.subr.mxu1 %v1525_v48 }
 0x4fb   : > { %1587 = vmatpush2.msra.mxu1 %v1524_v49 }
 0x4fc   : > { %1588 = vmatprep.subr.mxu1 %v1523_v50 }
 0x4fd   : > { %1589 = vmatpush2.msra.mxu1 %v1522_v51  ;;  %v1660_v51 = vld [vmem:[%s3009_s18] sm:$0x3] }
 0x4fe   : > { %1590 = vmatprep.subr.mxu1 %v1521_v52  ;;  %v1676_v52 = vld [vmem:[%s3010_s15] sm:$0x3] }
 0x4ff   : > { %1591 = vmatpush2.msra.mxu1 %v1520_v54  ;;  %v1665_v54 = vrot.slane %v1660_v51, %v2803_v0 }
 0x500   : > { %1592 = vmatprep.subr.mxu1 %v1519_v56  ;;  %v1669_v56 = vrot.slane %v1660_v51, %v2808_v2 }
 0x501   : > { %1593 = vmatpush2.msra.mxu1 %v1518_v58 }
 0x502   : > { %1594 = vmatprep.subr.mxu1 %v1517_v59  ;;  %v1681_v59 = vrot.slane %v1676_v52, %v2803_v0 }
 0x503   : > { %1595 = vmatpush2.msra.mxu1 %v1516_v60  ;;  %v1685_v60 = vrot.slane %v1676_v52, %v2808_v2 }
 0x504   : > { %1596 = vmatprep.subr.mxu1 %v1515_v61 }
 0x505   : > { %1597 = vmatpush2.msra.mxu1 %v1514_v62 }
 0x506   : > { %1598 = vmatprep.subr.mxu1 %v1513_v63 }
 0x507   : > { %1599 = vmatpush2.msra.mxu1 %v1512_v1 }
 0x508   : > { %1600 = vmatprep.subr.mxu1 %v1511_v3 }
 0x509   : > { %1601 = vmatpush2.msra.mxu1 %v1510_v4 }
 0x50a   : > { %1602 = vmatprep.subr.mxu1 %v1509_v5 }
 0x50b   : > { %1603 = vmatpush2.msra.mxu1 %v1508_v6 }
 0x50c   : > { %1604 = vmatprep.subr.mxu1 %v1507_v7 }
 0x50d   : > { %1605 = vmatpush2.msra.mxu1 %v1506_v8 }
 0x50e   : > { %1606 = vmatprep.subr.mxu1 %v1505_v9 }
 0x50f   : > { %1607 = vmatpush2.msra.mxu1 %v1504_v11 }
 0x510   : > { %1608 = vmatprep.subr.mxu1 %v1503_v12 }
 0x511   : > { %1609 = vmatpush2.msra.mxu1 %v1502_v13 }
 0x592   : > { %v1970_v14 = vpop.f32.mrf.mxu1 }
 0x594   : > { %v1445_v15 = vpop.f32.mrf.mxu1 }
 0x595   : > { %1610 = vmatprep.mubr.f32.mxu1 %v1445_v15  ;;  %v1959_v16 = vpop.f32.mrf.mxu0 }
 0x597   : > { %v1364_v17 = vpop.f32.mrf.mxu0 }
 0x598   : > { %1611 = vmatmul.mubr.f32.vlgmr.msra.gmra.mxu1 %v1364_v17 }
 0x599   : > { %1616 = vmatprep.mubr.f32.mxu1 %v1970_v14 }
 0x59c   : > { %1617 = vmatmul.mubr.f32.gmra.mxu1 %v1959_v16 }
 0x658   : > { %v1612_v21 = vpop.f32.mrf.mxu1 }
 0x659   : > { %v1613_v22 = vadd.f32 %v1612_v21, %v1539_v19 }
 0x65a   : > { %v1614_v23 = vpop.f32.mrf.mxu1 }
 0x65b   : > { %v1615_v24 = vadd.f32 %v1614_v23, %v1543_v20  ;;  %v1623_v26 = vadd.f32 %v1613_v22, %v2792_v53 }
 0x65c   : > { %v1618_v25 = vpop.f32.mrf.mxu1 }
 0x65d   : > { %v1624_v27 = vadd.f32 %v1615_v24, %v2788_v10  ;;  %v1619_v28 = vadd.f32 %v1618_v25, %v1539_v19 }
 0x65e   : > { %v1620_v29 = vpop.f32.mrf.mxu1 }
 0x65f   : > { %v1621_v30 = vadd.f32 %v1620_v29, %v1543_v20  ;;  %v1627_v31 = vadd.f32 %v1624_v27, %v1623_v26  ;;  %v1625_v32 = vadd.f32 %v1619_v28, %v2800_v57 }
 0x661   : > { %v1626_v33 = vadd.f32 %v1621_v30, %v2795_v55  ;;  %1628 = vadd.xlane.f32.xlu0 %v1627_v31 }
 0x663   : > { %v1630_v34 = vadd.f32 %v1626_v33, %v1625_v32 }
 0x665   : > { %1631 = vadd.xlane.f32.xlu1 %v1630_v34 }
 0x6ea   : > { %v1629_v35 = vpop.xlane.xlu0 %1628 }
 0x6eb   : > { %v1634_v36 = vmul.f32 0.00390625, %v1629_v35 }
 0x6ed   : > { %v1636_v37 = vsub.f32 %v1623_v26, %v1634_v36  ;;  %v1637_v38 = vsub.f32 %v1624_v27, %v1634_v36 }
 0x6ee   : > { %v1632_v39 = vpop.xlane.xlu1 %1631 }
 0x6ef   : > { %v1635_v40 = vmul.f32 0.00390625, %v1632_v39  ;;  %v1640_v53 = vmul.f32 %v1636_v37, %v1636_v37  ;;  %v1641_v41 = vmul.f32 %v1637_v38, %v1637_v38 }
 0x6f1   : > { %v1638_v10 = vsub.f32 %v1625_v32, %v1635_v40  ;;  %v1639_v42 = vsub.f32 %v1626_v33, %v1635_v40  ;;  %v1644_v43 = vadd.f32 %v1641_v41, %v1640_v53 }
 0x6f3   : > { %1645 = vadd.xlane.f32.xlu0 %v1644_v43  ;;  %v1642_v44 = vmul.f32 %v1638_v10, %v1638_v10  ;;  %v1643_v57 = vmul.f32 %v1639_v42, %v1639_v42 }
 0x6f5   : > { %v1647_v55 = vadd.f32 %v1643_v57, %v1642_v44 }
 0x6f7   : > { %1648 = vadd.xlane.f32.xlu1 %v1647_v55 }
 0x77c   : > { %v1646_v45 = vpop.xlane.xlu0 %1645 }
 0x77d   : > { %v1650_v46 = vmul.f32 0.00390625, %v1646_v45 }
 0x77f   : > { %v1652_v47 = vadd.f32 1e-05, %v1650_v46 }
 0x780   : > { %v1649_v48 = vpop.xlane.xlu1 %1648 }
 0x781   : > { %2139 = vrsqrt.f32 %v1652_v47  ;;  %v1651_v49 = vmul.f32 0.00390625, %v1649_v48 }
 0x783   : > { %v1653_v50 = vadd.f32 1e-05, %v1651_v49 }
 0x785   : > { %2141 = vrsqrt.f32 %v1653_v50 }
 0x78e   : > { %v2140_v58 = vpop.eup %2139 }
 0x78f   : > { %v1656_v61 = vmul.f32 %v2140_v58, %v1636_v37  ;;  %v1657_v62 = vmul.f32 %v2140_v58, %v1637_v38 }
 0x791   : > { %v1672_v63 = vmul.f32 %v1665_v54, %v1656_v61  ;;  %v1673_v1 = vmul.f32 %v1669_v56, %v1657_v62 }
 0x792   : > { %v2142_v3 = vpop.eup %2141 }
 0x793   : > { %v1688_v4 = vadd.f32 %v1681_v59, %v1672_v63  ;;  %v1689_v5 = vadd.f32 %v1685_v60, %v1673_v1  ;;  %v1658_v6 = vmul.f32 %v2142_v3, %v1638_v10  ;;  %v1659_v7 = vmul.f32 %v2142_v3, %v1639_v42 }
 0x795   : > { %1692 = vst [vmem:[%s2770_s6] sm:$0xff] %v1688_v4  ;;  %1693 = vst [vmem:[%s2770_s6 + $0x8] sm:$0xff] %v1689_v5  ;;  %v1674_v0 = vmul.f32 %v1665_v54, %v1658_v6  ;;  %v1675_v2 = vmul.f32 %v1669_v56, %v1659_v7 }
 0x797   : > { %v1690_v8 = vadd.f32 %v1681_v59, %v1674_v0  ;;  %v1691_v9 = vadd.f32 %v1685_v60, %v1675_v2 }
 0x799   : > { %1694 = vst [vmem:[%s2770_s6 + $0x10] sm:$0xff] %v1690_v8  ;;  %1695 = vst [vmem:[%s2770_s6 + $0x18] sm:$0xff] %v1691_v9 }
 0x79a   : > { %2316 = shalt.err (!%p2313_p5)
}
 0x79b   : > { %s2317_s16 = scalar_lea.hbm %s2851_s3, 512  ;;  %s2321_s9 = scalar_lea.hbm %s3013_s2, 2048 }
 0x79c   : > { %p2318_p7 = scmp.ne.s32.totalorder %s2851_s3, %s2317_s16  ;;  %p2322_p12 = scmp.lt.s32.totalorder %s2851_s3, %s3013_s2 }
 0x79d   : > { %p2323_p2 = scmp.lt.s32.totalorder %s2321_s9, %s2317_s16 }
 0x79e   : > { %p2319_p8 = pnand %p2318_p7, %p3014_p10 }
 0x79f   : > { %p2324_p3 = por %p2323_p2, %p2322_p12 }
 0x7a0   : > { %p2320_p13 = pneg %p2319_p8 }
 0x7a2   : > { %p2325_p0 = pnand %p2324_p3, %p2320_p13 }
 0x7a4   : > { %2328 = shalt.err (!%p2325_p0)
}
 0x7a5   : > { %s2450_s20 = smov 256   ;;  %s2451_s17 = smov 16  }
 0x7a6   : > { %1991 = dma.vmem_to_hbm [thread:$0]  (%p3014_p10), %s2853_s27, 512, %s2851_s3, %s2859_s21, %s2450_s20, %s2450_s20, %s2451_s17  }
 0x7a7 PF: > { %s3015_s28 = sld [smem:[#allocation24_spill]]  ;;  %p2026_p4 = scmp.ge.s32.totalorder %s2439_s13, 2 }
 0x7a8   : > { %s3016_s0 = sld [smem:[#allocation30_spill]] }
 0x7ad   : > { %s1728_s5 = sand.u32 1, %s3015_s28  }
 0x7ae   : > { %p3017_p9 = scmp.ne.s32.totalorder %s3016_s0, 0  ;;  %s1729_s22 = scalar_lea.sflag [#allocation8], %s1728_s5 }
 0x7b0   : > { %p2014_p1 = pnand %p2026_p4, %p3017_p9 }
 0x7b2   : > { %p2015_p6 = pneg %p2014_p1 }
 0x7b4   : > { %2394 = dma.done.wait (%p2015_p6), %s1729_s22, 512  }
 0x7b5   : > { %2396 = vsyncadd (%p2015_p6), %s1729_s22, 4294966784  ;;  %s33_s13 = sadd.s32 1, %s2439_s13   ;;  %s3018_s21 = sld [smem:[#allocation25_spill]] }
 0x7b6   : > { %p30_p11 = scmp.ge.s32.totalorder %s33_s13, 6   ;;  %s3019_s4 = sld [smem:[#allocation31_spill]] }
 0x7b7   : > { %s3020_s7 = sld [smem:[#allocation33_spill]]  ;;  %s3021_s22 = smov %s2407_s23 }
 0x7b8   : > { %s3022_s23 = smov %s2719_s19  ;;  %s3023_s24 = smov %s2415_s25 }
 0x7b9   : > { %s3024_s25 = smov %s2419_s26  ;;  %s3025_s26 = smov %s2716_s8 }
 0x7ba   : > { %s3026_s27 = smov %s2431_s29  ;;  %s3027_s28 = smov %s2435_s30 }
 0x7bb   :  { %32 = sbr.rel (!%p30_p11) target bundleno = 26 (0x1a), region = 149 }
 0x7bc   : > { %s3028_s29 = smov %s3019_s4 }
 0x7bd   : > { %s3029_s30 = smov %s3020_s7 }
 0x7c0   :  { %1734 = vsyncpa [#allocation7], 1 }
 0x7c1   :  { %1736 = vsyncpa [#allocation7 + $0x1], 1 }
 0x7c2   :  { %1737 = vsyncpa [#allocation10], 1 }
 0x7c3   :  { %1739 = vsyncpa [#allocation10 + $0x1], 1 }
 0x7c4   :  { %1740 = vsyncpa [#allocation13], 1 }
 0x7c5   :  { %1741 = vsyncpa [#allocation16], 1 }
 0x7c6   :  { %1742 = vsyncpa [#allocation8], 1 }
 0x7c7   :  { %1744 = vsyncpa [#allocation8 + $0x1], 1 }

</bundles_post_ra>
